<compile_context>
chip_gen: v7x
topology: tpu7x:2x2x1
jax: 0.10.0
libtpu: 0.0.40
codegen_flags: <defaults>
</compile_context>

<pallas_src>
import random
import numpy as np

import jax
import jax.numpy as jnp
from jax.experimental import pallas as pl
from jax.experimental.pallas import tpu as pltpu


# -----------------------------------------------------------------------------
# Host-side masking (mirrors apply_mlm_masking / apply_sfbo_masking semantics,
# with deterministic seeded RNG instead of torch.rand / random).
# -----------------------------------------------------------------------------
def apply_mlm_masking_np(packet_seq, mlm_prob, rng):
    masked = packet_seq.copy()
    valid = packet_seq != 0
    mlm_mask = (rng.random(packet_seq.shape[0]) < mlm_prob) & valid
    masked[mlm_mask] = 4
    return masked


def apply_sfbo_masking_np(packet_seq, field_pos, max_span_length, padding_value,
                          pyrand, rng, sfbo_prob=0.15):
    masked = packet_seq.copy()
    unique_fields = sorted(set(int(v) for v in field_pos if int(v) != 0))
    num_spans = pyrand.randint(1, max_span_length)
    if num_spans > len(unique_fields):
        raise ValueError("num_spans exceeds the length of unique_fields list")
    start_index = pyrand.randint(0, len(unique_fields) - num_spans)
    span_selection = unique_fields[start_index:start_index + num_spans]
    span_positions = [i for i, v in enumerate(field_pos) if int(v) in span_selection]
    span_positions = [i for i in span_positions if i < len(packet_seq)]
    sfbo_mask = rng.random(len(span_positions)) < sfbo_prob
    for idx, m in zip(span_positions, sfbo_mask):
        if m:
            masked[idx] = padding_value
    return masked


def apply_mlm_sfbo_masking_np(packet_sequences, field_pos, mlm_prob=0.15,
                              sfbo_prob=0.15, max_span_length=6, seed=0):
    pyrand = random.Random(seed)
    rng = np.random.default_rng(seed)
    masked_sequences, span_masks = [], []
    for pkt, fp in zip(packet_sequences, field_pos):
        masked_sequences.append(apply_mlm_masking_np(pkt, mlm_prob, rng))
        span_masks.append(apply_sfbo_masking_np(pkt, fp, max_span_length, 4,
                                                pyrand, rng, sfbo_prob))
    return np.stack(masked_sequences), np.stack(span_masks)


# -----------------------------------------------------------------------------
# Pallas kernels
# -----------------------------------------------------------------------------
def _layernorm(x, g, b, eps=1e-5):
    mu = jnp.mean(x, axis=-1, keepdims=True)
    var = jnp.mean((x - mu) ** 2, axis=-1, keepdims=True)
    return (x - mu) * jax.lax.rsqrt(var + eps) * g + b


def make_encoder_layer_kernel(num_heads, bt, seq, emb):
    """One nn.TransformerEncoderLayer (post-LN, ReLU FFN, no dropout).

    Processes a block of `bt` batch rows per grid step. All matmuls run on the
    MXU with bf16 operands and f32 accumulation; attention is batched over the
    bt rows per head; per-head contexts are assembled lane-dense in a VMEM
    scratch so the output projection is a single matmul.
    """
    hd = emb // num_heads
    scale = 1.0 / float(np.sqrt(hd))
    n = bt * seq

    def kernel(x_ref, wqkv, bqkv, wo, bo, g1, be1, w1, b1, w2, b2, g2, be2,
               o_ref, ctx_scratch):
        x = x_ref[...].astype(jnp.float32)               # (bt, S, E)
        xf = x.reshape(n, emb)                           # collapse leading dims

        # Fused QKV projection: one (n, E) @ (E, 3E) MXU matmul.
        qkv = jnp.dot(xf.astype(jnp.bfloat16), wqkv[...],
                      preferred_element_type=jnp.float32) + bqkv[...]   # (n, 3E)

        # Multi-head attention, batched over the bt rows per head.
        for h in range(num_heads):
            lo = h * hd
            qh = (qkv[:, lo:lo + hd] * scale).astype(jnp.bfloat16).reshape(bt, seq, hd)
            kh = qkv[:, emb + lo:emb + lo + hd].astype(jnp.bfloat16).reshape(bt, seq, hd)
            vh = qkv[:, 2 * emb + lo:2 * emb + lo + hd].astype(jnp.bfloat16).reshape(bt, seq, hd)

            s = jnp.einsum('bqd,bkd->bqk', qh, kh,
                           preferred_element_type=jnp.float32)          # (bt,S,S)
            s = s - jnp.max(s, axis=-1, keepdims=True)
            p = jnp.exp(s)
            p = p * pl.reciprocal(jnp.sum(p, axis=-1, keepdims=True), approx=True)
            ctx_h = jnp.einsum('bqk,bkd->bqd', p.astype(jnp.bfloat16), vh,
                               preferred_element_type=jnp.float32)      # (bt,S,hd)
            ctx_scratch[:, lo:lo + hd] = ctx_h.reshape(n, hd)

        ctx = ctx_scratch[...]                                          # (n, E)
        attn = jnp.dot(ctx.astype(jnp.bfloat16), wo[...],
                       preferred_element_type=jnp.float32) + bo[...]

        x1 = _layernorm(xf + attn, g1[...], be1[...])
        h1 = jnp.maximum(
            jnp.dot(x1.astype(jnp.bfloat16), w1[...],
                    preferred_element_type=jnp.float32) + b1[...], 0.0)
        ffn = jnp.dot(h1.astype(jnp.bfloat16), w2[...],
                      preferred_element_type=jnp.float32) + b2[...]
        x2 = _layernorm(x1 + ffn, g2[...], be2[...])
        o_ref[...] = x2.reshape(bt, seq, emb).astype(o_ref.dtype)

    return kernel


def make_mlm_loss_kernel(n_total):
    inv_n = 1.0 / float(n_total)

    def kernel(x_ref, w_ref, b_ref, tgt_ref, loss_ref, acc_ref):
        @pl.when(pl.program_id(0) == 0)
        def _():
            acc_ref[...] = jnp.zeros_like(acc_ref)

        x = x_ref[...].astype(jnp.bfloat16)                              # (Tn, E)
        logits = jnp.dot(x, w_ref[...],
                         preferred_element_type=jnp.float32) + b_ref[...]
        z = logits - jnp.max(logits, axis=-1, keepdims=True)
        logp = z - jnp.log(jnp.sum(jnp.exp(z), axis=-1, keepdims=True))
        tgt = tgt_ref[...]                                               # (Tn, 1) int32
        iota = jax.lax.broadcasted_iota(jnp.int32, logp.shape, 1)
        nll = -jnp.sum(jnp.where(iota == tgt, logp, 0.0),
                       axis=-1, keepdims=True)                           # (Tn, 1)
        acc_ref[...] += jnp.sum(nll, axis=0, keepdims=True)
        loss_ref[...] = acc_ref[...] * inv_n                             # final step wins

    return kernel


def make_sfbo_loss_kernel(n_total):
    inv_n = 1.0 / float(n_total)

    def kernel(x_ref, w1_ref, b1_ref, w2_ref, b2_ref, tgt_ref, loss_ref, acc_ref):
        @pl.when(pl.program_id(0) == 0)
        def _():
            acc_ref[...] = jnp.zeros_like(acc_ref)

        x = x_ref[...].astype(jnp.bfloat16)
        h = jnp.maximum(
            jnp.dot(x, w1_ref[...], preferred_element_type=jnp.float32) + b1_ref[...],
            0.0)
        logits = jnp.dot(h.astype(jnp.bfloat16), w2_ref[...],
                         preferred_element_type=jnp.float32) + b2_ref[...]
        z = logits - jnp.max(logits, axis=-1, keepdims=True)
        logp = z - jnp.log(jnp.sum(jnp.exp(z), axis=-1, keepdims=True))
        tgt = tgt_ref[...]
        iota = jax.lax.broadcasted_iota(jnp.int32, logp.shape, 1)
        nll = -jnp.sum(jnp.where(iota == tgt, logp, 0.0),
                       axis=-1, keepdims=True)
        acc_ref[...] += jnp.sum(nll, axis=0, keepdims=True)
        loss_ref[...] = acc_ref[...] * inv_n

    return kernel


def mean2_kernel(a_ref, b_ref, o_ref):
    o_ref[...] = 0.5 * (a_ref[...] + b_ref[...])


# -----------------------------------------------------------------------------
# Pallas wrappers
# -----------------------------------------------------------------------------
_LAYER_PARAM_ORDER = ["wqkv", "bqkv", "wo", "bo",
                      "ln1_g", "ln1_b", "w1", "b1", "w2", "b2", "ln2_g", "ln2_b"]


def _full_spec(shape):
    n = len(shape)
    return pl.BlockSpec(shape, lambda b, _n=n: (0,) * _n)


def encoder_layer(x, lp, num_heads, bt):
    B2, S, E = x.shape
    assert B2 % bt == 0
    in_specs = [pl.BlockSpec((bt, S, E), lambda b: (b, 0, 0))]
    in_specs += [_full_spec(tuple(lp[name].shape)) for name in _LAYER_PARAM_ORDER]
    return pl.pallas_call(
        make_encoder_layer_kernel(num_heads, bt, S, E),
        out_shape=jax.ShapeDtypeStruct((B2, S, E), jnp.float32),
        grid=(B2 // bt,),
        in_specs=in_specs,
        out_specs=pl.BlockSpec((bt, S, E), lambda b: (b, 0, 0)),
        scratch_shapes=[pltpu.VMEM((bt * S, E), jnp.float32)],
        compiler_params=pltpu.CompilerParams(dimension_semantics=("parallel",)),
    )(x, *[lp[name] for name in _LAYER_PARAM_ORDER])


def run_encoder(x, layers, num_heads):
    B2, S, E = x.shape
    # Fold batch rows into one block to amortize per-step overhead, but keep
    # >= 2 grid steps so both v7x TensorCores get work.
    bt = B2 // 2 if (B2 % 2 == 0 and B2 >= 2) else 1
    for lp in layers:
        x = encoder_layer(x, lp, num_heads, bt)
    return x


def _choose_row_tile(n):
    for t in (512, 256, 128, 64, 32, 16, 8):
        if n % t == 0:
            return t
    return n


def mlm_loss_pallas(enc_flat, w, b, targets):
    N, E = enc_flat.shape
    V = w.shape[1]
    tn = _choose_row_tile(N)
    loss = pl.pallas_call(
        make_mlm_loss_kernel(N),
        out_shape=jax.ShapeDtypeStruct((1, 1), jnp.float32),
        grid=(N // tn,),
        in_specs=[pl.BlockSpec((tn, E), lambda i: (i, 0)),
                  pl.BlockSpec((E, V), lambda i: (0, 0)),
                  pl.BlockSpec((1, V), lambda i: (0, 0)),
                  pl.BlockSpec((tn, 1), lambda i: (i, 0))],
        out_specs=pl.BlockSpec((1, 1), lambda i: (0, 0)),
        scratch_shapes=[pltpu.VMEM((1, 1), jnp.float32)],
        compiler_params=pltpu.CompilerParams(dimension_semantics=("arbitrary",)),
    )(enc_flat, w, b, targets)
    return loss[0, 0]


def sfbo_loss_pallas(enc_flat, w1, b1, w2, b2, targets):
    N, E = enc_flat.shape
    H = w1.shape[1]
    V = w2.shape[1]
    tn = _choose_row_tile(N)
    loss = pl.pallas_call(
        make_sfbo_loss_kernel(N),
        out_shape=jax.ShapeDtypeStruct((1, 1), jnp.float32),
        grid=(N // tn,),
        in_specs=[pl.BlockSpec((tn, E), lambda i: (i, 0)),
                  pl.BlockSpec((E, H), lambda i: (0, 0)),
                  pl.BlockSpec((1, H), lambda i: (0, 0)),
                  pl.BlockSpec((H, V), lambda i: (0, 0)),
                  pl.BlockSpec((1, V), lambda i: (0, 0)),
                  pl.BlockSpec((tn, 1), lambda i: (i, 0))],
        out_specs=pl.BlockSpec((1, 1), lambda i: (0, 0)),
        scratch_shapes=[pltpu.VMEM((1, 1), jnp.float32)],
        compiler_params=pltpu.CompilerParams(dimension_semantics=("arbitrary",)),
    )(enc_flat, w1, b1, w2, b2, targets)
    return loss[0, 0]


def mean2_pallas(enc_all, b_half):
    # enc_all is (2B, S, E): rows [0, B) = mask stream, [B, 2B) = span stream.
    # Two offset BlockSpecs on the same array -> each element is read exactly
    # once; output is the per-row mean of the two streams.
    _, S, E = enc_all.shape
    return pl.pallas_call(
        mean2_kernel,
        out_shape=jax.ShapeDtypeStruct((b_half, S, E), jnp.float32),
        grid=(b_half,),
        in_specs=[pl.BlockSpec((1, S, E), lambda b: (b, 0, 0)),
                  pl.BlockSpec((1, S, E), lambda b, _o=b_half: (b + _o, 0, 0))],
        out_specs=pl.BlockSpec((1, S, E), lambda b: (b, 0, 0)),
        compiler_params=pltpu.CompilerParams(dimension_semantics=("parallel",)),
    )(enc_all, enc_all)


# -----------------------------------------------------------------------------
# Parameters & embedding glue
# -----------------------------------------------------------------------------
def init_params(key, vocab, E, max_len, num_layers):
    def nrm(k, shape, scale=0.02, dtype=jnp.float32):
        return (scale * jax.random.normal(k, shape)).astype(dtype)

    bf = jnp.bfloat16
    keys = iter(jax.random.split(key, 16 + 8 * num_layers))
    p = {
        "tok_emb": nrm(next(keys), (vocab, E)),
        "field_emb": nrm(next(keys), (max_len, E)),
        "header_emb": nrm(next(keys), (max_len, E)),
        "pos_emb": nrm(next(keys), (max_len, E)),
        "mlm_w": nrm(next(keys), (E, vocab), dtype=bf),
        "mlm_b": jnp.zeros((1, vocab), jnp.float32),
        "sfbo_w1": nrm(next(keys), (E, E), dtype=bf),
        "sfbo_b1": jnp.zeros((1, E), jnp.float32),
        "sfbo_w2": nrm(next(keys), (E, vocab), dtype=bf),
        "sfbo_b2": jnp.zeros((1, vocab), jnp.float32),
        "layers": [],
    }
    for _ in range(num_layers):
        lp = {
            "wqkv": nrm(next(keys), (E, 3 * E), dtype=bf),   # fused Q/K/V
            "bqkv": jnp.zeros((1, 3 * E), jnp.float32),
            "wo": nrm(next(keys), (E, E), dtype=bf),
            "bo": jnp.zeros((1, E), jnp.float32),
            "ln1_g": jnp.ones((1, E), jnp.float32),
            "ln1_b": jnp.zeros((1, E), jnp.float32),
            "w1": nrm(next(keys), (E, 4 * E), dtype=bf),
            "b1": jnp.zeros((1, 4 * E), jnp.float32),
            "w2": nrm(next(keys), (4 * E, E), dtype=bf),
            "b2": jnp.zeros((1, E), jnp.float32),
            "ln2_g": jnp.ones((1, E), jnp.float32),
            "ln2_b": jnp.zeros((1, E), jnp.float32),
        }
        p["layers"].append(lp)
    return p


def packet_embedding(p, tokens, field_pos, header_pos):
    B, S = tokens.shape
    e = (p["tok_emb"][tokens]
         + p["field_emb"][field_pos]
         + p["header_emb"][header_pos]
         + p["pos_emb"][jnp.arange(S)][None, :, :])
    return e.astype(jnp.float32)                                     # (B, S, E)


def packet_level_encoder_forward(p, packet_sequences, field_pos, header_pos,
                                 num_heads):
    # Host-side masking (matches the .cpu() masking in the PyTorch reference).
    masked_np, span_np = apply_mlm_sfbo_masking_np(
        np.asarray(packet_sequences), np.asarray(field_pos))
    masked_packets = jnp.asarray(masked_np, dtype=jnp.int32)
    span_masks = jnp.asarray(span_np, dtype=jnp.int32)

    mask_emb = packet_embedding(p, masked_packets, field_pos, header_pos)
    span_emb = packet_embedding(p, span_masks, field_pos, header_pos)
    B, S, E = mask_emb.shape

    # Fuse both streams along batch: one pass through the encoder stack.
    x_all = jnp.concatenate([mask_emb, span_emb], axis=0)               # (2B,S,E)
    enc_all = run_encoder(x_all, p["layers"], num_heads)                # (2B,S,E)
    mask_enc = enc_all[:B]
    span_enc = enc_all[B:]

    # Targets mirror the PyTorch reference exactly: CE against the masked
    # sequences themselves, mean over all positions (no ignore_index there).
    mlm_loss = mlm_loss_pallas(
        mask_enc.reshape(B * S, E), p["mlm_w"], p["mlm_b"],
        masked_packets.reshape(B * S, 1))
    sfbo_loss = sfbo_loss_pallas(
        span_enc.reshape(B * S, E), p["sfbo_w1"], p["sfbo_b1"],
        p["sfbo_w2"], p["sfbo_b2"], span_masks.reshape(B * S, 1))

    mean_encoded = mean2_pallas(enc_all, B)
    return mlm_loss, sfbo_loss, mean_encoded


# -----------------------------------------------------------------------------
if __name__ == "__main__":
    B, S = 2, 8
    VOCAB, E, MAX_LEN, HEADS, LAYERS = 16, 32, 16, 4, 2

    key = jax.random.PRNGKey(0)
    k_data, k_param = jax.random.split(key)

    packet_sequences = jax.random.randint(k_data, (B, S), 5, VOCAB, dtype=jnp.int32)
    packet_sequences = packet_sequences.at[:, -1].set(0)            # padding token
    field_pos = jnp.tile(jnp.arange(1, S + 1, dtype=jnp.int32), (B, 1))
    header_pos = jnp.tile(jnp.arange(S, dtype=jnp.int32) % 4, (B, 1))

    params = init_params(k_param, VOCAB, E, MAX_LEN, LAYERS)

    mlm_loss, sfbo_loss, mean_enc = packet_level_encoder_forward(
        params, packet_sequences, field_pos, header_pos, HEADS)

    jax.block_until_ready((mlm_loss, sfbo_loss, mean_enc))
    assert mean_enc.shape == (B, S, E)
    assert jnp.isfinite(mlm_loss) and jnp.isfinite(sfbo_loss)
    print("KERNEL_OK")
</pallas_src>

<mosaic_0001>
module attributes {stable_mosaic.version = 11 : i64} {
  func.func @kernel(%arg0: i32, %arg1: memref<2x8x32xf32, #tpu.memory_space<vmem>>, %arg2: memref<32x96xbf16, #tpu.memory_space<vmem>>, %arg3: memref<1x96xf32, #tpu.memory_space<vmem>>, %arg4: memref<32x32xbf16, #tpu.memory_space<vmem>>, %arg5: memref<1x32xf32, #tpu.memory_space<vmem>>, %arg6: memref<1x32xf32, #tpu.memory_space<vmem>>, %arg7: memref<1x32xf32, #tpu.memory_space<vmem>>, %arg8: memref<32x128xbf16, #tpu.memory_space<vmem>>, %arg9: memref<1x128xf32, #tpu.memory_space<vmem>>, %arg10: memref<128x32xbf16, #tpu.memory_space<vmem>>, %arg11: memref<1x32xf32, #tpu.memory_space<vmem>>, %arg12: memref<1x32xf32, #tpu.memory_space<vmem>>, %arg13: memref<1x32xf32, #tpu.memory_space<vmem>>, %arg14: memref<2x8x32xf32, #tpu.memory_space<vmem>>, %arg15: memref<16x32xf32, #tpu.memory_space<vmem>>) attributes {dimension_semantics = [#tpu.dimension_semantics<parallel>], iteration_bounds = array<i64: 2>, scalar_prefetch = 0 : i64, scratch_operands = 1 : i64, tpu.core_type = #tpu.core_type<tc>, window_params = [{transform_indices = @transform_0, window_bounds = array<i64: 2, 8, 32>}, {pipeline_mode = #tpu.pipeline_mode<synchronous>, transform_indices = @transform_1, window_bounds = array<i64: 32, 96>}, {pipeline_mode = #tpu.pipeline_mode<synchronous>, transform_indices = @transform_2, window_bounds = array<i64: 1, 96>}, {pipeline_mode = #tpu.pipeline_mode<synchronous>, transform_indices = @transform_3, window_bounds = array<i64: 32, 32>}, {pipeline_mode = #tpu.pipeline_mode<synchronous>, transform_indices = @transform_4, window_bounds = array<i64: 1, 32>}, {pipeline_mode = #tpu.pipeline_mode<synchronous>, transform_indices = @transform_5, window_bounds = array<i64: 1, 32>}, {pipeline_mode = #tpu.pipeline_mode<synchronous>, transform_indices = @transform_6, window_bounds = array<i64: 1, 32>}, {pipeline_mode = #tpu.pipeline_mode<synchronous>, transform_indices = @transform_7, window_bounds = array<i64: 32, 128>}, {pipeline_mode = #tpu.pipeline_mode<synchronous>, transform_indices = @transform_8, window_bounds = array<i64: 1, 128>}, {pipeline_mode = #tpu.pipeline_mode<synchronous>, transform_indices = @transform_9, window_bounds = array<i64: 128, 32>}, {pipeline_mode = #tpu.pipeline_mode<synchronous>, transform_indices = @transform_10, window_bounds = array<i64: 1, 32>}, {pipeline_mode = #tpu.pipeline_mode<synchronous>, transform_indices = @transform_11, window_bounds = array<i64: 1, 32>}, {pipeline_mode = #tpu.pipeline_mode<synchronous>, transform_indices = @transform_12, window_bounds = array<i64: 1, 32>}, {transform_indices = @transform_13, window_bounds = array<i64: 2, 8, 32>}]} {
    %c0 = arith.constant 0 : index
    %c0_0 = arith.constant 0 : index
    %c0_1 = arith.constant 0 : index
    %0 = vector.load %arg1[%c0, %c0_0, %c0_1] : memref<2x8x32xf32, #tpu.memory_space<vmem>>, vector<2x8x32xf32>
    %1 = vector.shape_cast %0 : vector<2x8x32xf32> to vector<16x32xf32>
    %2 = arith.truncf %1 : vector<16x32xf32> to vector<16x32xbf16>
    %c0_2 = arith.constant 0 : index
    %c0_3 = arith.constant 0 : index
    %3 = vector.load %arg2[%c0_2, %c0_3] : memref<32x96xbf16, #tpu.memory_space<vmem>>, vector<32x96xbf16>
    %cst = arith.constant dense<0.000000e+00> : vector<16x96xf32>
    %4 = tpu.matmul %2, %3, %cst {dimension_numbers = #tpu.dot_dimension_numbers<[1], [0], [0], [1], [0, 0, 1, 1], [], []>} : vector<16x32xbf16>, vector<32x96xbf16>, vector<16x96xf32> -> vector<16x96xf32>
    %c0_4 = arith.constant 0 : index
    %c0_5 = arith.constant 0 : index
    %5 = vector.load %arg3[%c0_4, %c0_5] : memref<1x96xf32, #tpu.memory_space<vmem>>, vector<1x96xf32>
    %6 = vector.broadcast %5 : vector<1x96xf32> to vector<16x96xf32>
    %7 = arith.addf %4, %6 : vector<16x96xf32>
    %8 = vector.extract_strided_slice %7 {offsets = [0, 0], sizes = [16, 8], strides = [1, 1]} : vector<16x96xf32> to vector<16x8xf32>
    %cst_6 = arith.constant 0.353553385 : f32
    %9 = vector.broadcast %cst_6 : f32 to vector<16x8xf32>
    %10 = arith.mulf %8, %9 : vector<16x8xf32>
    %11 = arith.truncf %10 : vector<16x8xf32> to vector<16x8xbf16>
    %12 = vector.shape_cast %11 : vector<16x8xbf16> to vector<2x8x8xbf16>
    %13 = vector.extract_strided_slice %7 {offsets = [0, 32], sizes = [16, 8], strides = [1, 1]} : vector<16x96xf32> to vector<16x8xf32>
    %14 = arith.truncf %13 : vector<16x8xf32> to vector<16x8xbf16>
    %15 = vector.shape_cast %14 : vector<16x8xbf16> to vector<2x8x8xbf16>
    %16 = vector.extract_strided_slice %7 {offsets = [0, 64], sizes = [16, 8], strides = [1, 1]} : vector<16x96xf32> to vector<16x8xf32>
    %17 = arith.truncf %16 : vector<16x8xf32> to vector<16x8xbf16>
    %18 = vector.shape_cast %17 : vector<16x8xbf16> to vector<2x8x8xbf16>
    "tpu.trace_start"() <{level = 10 : i32, message = "bqd,bkd->bqk"}> : () -> ()
    %cst_7 = arith.constant dense<0.000000e+00> : vector<2x8x8xf32>
    %19 = tpu.matmul %12, %15, %cst_7 {dimension_numbers = #tpu.dot_dimension_numbers<[2], [2], [1], [1], [0, 0, 0, 1, 1, 1], [0], [0]>} : vector<2x8x8xbf16>, vector<2x8x8xbf16>, vector<2x8x8xf32> -> vector<2x8x8xf32>
    "tpu.trace_stop"() : () -> ()
    %cst_8 = arith.constant dense<0xFF800000> : vector<2x8xf32>
    %20 = vector.multi_reduction <maximumf>, %19, %cst_8 [2] : vector<2x8x8xf32> to vector<2x8xf32>
    %21 = vector.shape_cast %20 : vector<2x8xf32> to vector<2x8x1xf32>
    %22 = vector.broadcast %21 : vector<2x8x1xf32> to vector<2x8x8xf32>
    %23 = arith.subf %19, %22 : vector<2x8x8xf32>
    %24 = math.exp %23 : vector<2x8x8xf32>
    %cst_9 = arith.constant dense<0.000000e+00> : vector<2x8xf32>
    %25 = vector.multi_reduction <add>, %24, %cst_9 [2] : vector<2x8x8xf32> to vector<2x8xf32>
    %26 = vector.shape_cast %25 : vector<2x8xf32> to vector<2x8x1xf32>
    %27 = tpu.reciprocal %26 {approx = true} : vector<2x8x1xf32> -> vector<2x8x1xf32>
    %28 = vector.broadcast %27 : vector<2x8x1xf32> to vector<2x8x8xf32>
    %29 = arith.mulf %24, %28 : vector<2x8x8xf32>
    %30 = arith.truncf %29 : vector<2x8x8xf32> to vector<2x8x8xbf16>
    "tpu.trace_start"() <{level = 10 : i32, message = "bqk,bkd->bqd"}> : () -> ()
    %cst_10 = arith.constant dense<0.000000e+00> : vector<2x8x8xf32>
    %31 = tpu.matmul %30, %18, %cst_10 {dimension_numbers = #tpu.dot_dimension_numbers<[2], [1], [1], [2], [0, 0, 0, 1, 1, 2], [0], [0]>} : vector<2x8x8xbf16>, vector<2x8x8xbf16>, vector<2x8x8xf32> -> vector<2x8x8xf32>
    "tpu.trace_stop"() : () -> ()
    %32 = vector.shape_cast %31 : vector<2x8x8xf32> to vector<16x8xf32>
    %c0_11 = arith.constant 0 : index
    %c0_12 = arith.constant 0 : index
    %33 = vector.load %arg15[%c0_11, %c0_12] : memref<16x32xf32, #tpu.memory_space<vmem>>, vector<16x8xf32>
    tpu.vector_store %arg15[%c0_11, %c0_12], %32 {strides = array<i32>} : memref<16x32xf32, #tpu.memory_space<vmem>>, vector<16x8xf32>,
    %34 = vector.extract_strided_slice %7 {offsets = [0, 8], sizes = [16, 8], strides = [1, 1]} : vector<16x96xf32> to vector<16x8xf32>
    %cst_13 = arith.constant 0.353553385 : f32
    %35 = vector.broadcast %cst_13 : f32 to vector<16x8xf32>
    %36 = arith.mulf %34, %35 : vector<16x8xf32>
    %37 = arith.truncf %36 : vector<16x8xf32> to vector<16x8xbf16>
    %38 = vector.shape_cast %37 : vector<16x8xbf16> to vector<2x8x8xbf16>
    %39 = vector.extract_strided_slice %7 {offsets = [0, 40], sizes = [16, 8], strides = [1, 1]} : vector<16x96xf32> to vector<16x8xf32>
    %40 = arith.truncf %39 : vector<16x8xf32> to vector<16x8xbf16>
    %41 = vector.shape_cast %40 : vector<16x8xbf16> to vector<2x8x8xbf16>
    %42 = vector.extract_strided_slice %7 {offsets = [0, 72], sizes = [16, 8], strides = [1, 1]} : vector<16x96xf32> to vector<16x8xf32>
    %43 = arith.truncf %42 : vector<16x8xf32> to vector<16x8xbf16>
    %44 = vector.shape_cast %43 : vector<16x8xbf16> to vector<2x8x8xbf16>
    "tpu.trace_start"() <{level = 10 : i32, message = "bqd,bkd->bqk"}> : () -> ()
    %cst_14 = arith.constant dense<0.000000e+00> : vector<2x8x8xf32>
    %45 = tpu.matmul %38, %41, %cst_14 {dimension_numbers = #tpu.dot_dimension_numbers<[2], [2], [1], [1], [0, 0, 0, 1, 1, 1], [0], [0]>} : vector<2x8x8xbf16>, vector<2x8x8xbf16>, vector<2x8x8xf32> -> vector<2x8x8xf32>
    "tpu.trace_stop"() : () -> ()
    %cst_15 = arith.constant dense<0xFF800000> : vector<2x8xf32>
    %46 = vector.multi_reduction <maximumf>, %45, %cst_15 [2] : vector<2x8x8xf32> to vector<2x8xf32>
    %47 = vector.shape_cast %46 : vector<2x8xf32> to vector<2x8x1xf32>
    %48 = vector.broadcast %47 : vector<2x8x1xf32> to vector<2x8x8xf32>
    %49 = arith.subf %45, %48 : vector<2x8x8xf32>
    %50 = math.exp %49 : vector<2x8x8xf32>
    %cst_16 = arith.constant dense<0.000000e+00> : vector<2x8xf32>
    %51 = vector.multi_reduction <add>, %50, %cst_16 [2] : vector<2x8x8xf32> to vector<2x8xf32>
    %52 = vector.shape_cast %51 : vector<2x8xf32> to vector<2x8x1xf32>
    %53 = tpu.reciprocal %52 {approx = true} : vector<2x8x1xf32> -> vector<2x8x1xf32>
    %54 = vector.broadcast %53 : vector<2x8x1xf32> to vector<2x8x8xf32>
    %55 = arith.mulf %50, %54 : vector<2x8x8xf32>
    %56 = arith.truncf %55 : vector<2x8x8xf32> to vector<2x8x8xbf16>
    "tpu.trace_start"() <{level = 10 : i32, message = "bqk,bkd->bqd"}> : () -> ()
    %cst_17 = arith.constant dense<0.000000e+00> : vector<2x8x8xf32>
    %57 = tpu.matmul %56, %44, %cst_17 {dimension_numbers = #tpu.dot_dimension_numbers<[2], [1], [1], [2], [0, 0, 0, 1, 1, 2], [0], [0]>} : vector<2x8x8xbf16>, vector<2x8x8xbf16>, vector<2x8x8xf32> -> vector<2x8x8xf32>
    "tpu.trace_stop"() : () -> ()
    %58 = vector.shape_cast %57 : vector<2x8x8xf32> to vector<16x8xf32>
    %c0_18 = arith.constant 0 : index
    %c8 = arith.constant 8 : index
    %59 = vector.load %arg15[%c0_18, %c8] : memref<16x32xf32, #tpu.memory_space<vmem>>, vector<16x8xf32>
    tpu.vector_store %arg15[%c0_18, %c8], %58 {strides = array<i32>} : memref<16x32xf32, #tpu.memory_space<vmem>>, vector<16x8xf32>,
    %60 = vector.extract_strided_slice %7 {offsets = [0, 16], sizes = [16, 8], strides = [1, 1]} : vector<16x96xf32> to vector<16x8xf32>
    %cst_19 = arith.constant 0.353553385 : f32
    %61 = vector.broadcast %cst_19 : f32 to vector<16x8xf32>
    %62 = arith.mulf %60, %61 : vector<16x8xf32>
    %63 = arith.truncf %62 : vector<16x8xf32> to vector<16x8xbf16>
    %64 = vector.shape_cast %63 : vector<16x8xbf16> to vector<2x8x8xbf16>
    %65 = vector.extract_strided_slice %7 {offsets = [0, 48], sizes = [16, 8], strides = [1, 1]} : vector<16x96xf32> to vector<16x8xf32>
    %66 = arith.truncf %65 : vector<16x8xf32> to vector<16x8xbf16>
    %67 = vector.shape_cast %66 : vector<16x8xbf16> to vector<2x8x8xbf16>
    %68 = vector.extract_strided_slice %7 {offsets = [0, 80], sizes = [16, 8], strides = [1, 1]} : vector<16x96xf32> to vector<16x8xf32>
    %69 = arith.truncf %68 : vector<16x8xf32> to vector<16x8xbf16>
    %70 = vector.shape_cast %69 : vector<16x8xbf16> to vector<2x8x8xbf16>
    "tpu.trace_start"() <{level = 10 : i32, message = "bqd,bkd->bqk"}> : () -> ()
    %cst_20 = arith.constant dense<0.000000e+00> : vector<2x8x8xf32>
    %71 = tpu.matmul %64, %67, %cst_20 {dimension_numbers = #tpu.dot_dimension_numbers<[2], [2], [1], [1], [0, 0, 0, 1, 1, 1], [0], [0]>} : vector<2x8x8xbf16>, vector<2x8x8xbf16>, vector<2x8x8xf32> -> vector<2x8x8xf32>
    "tpu.trace_stop"() : () -> ()
    %cst_21 = arith.constant dense<0xFF800000> : vector<2x8xf32>
    %72 = vector.multi_reduction <maximumf>, %71, %cst_21 [2] : vector<2x8x8xf32> to vector<2x8xf32>
    %73 = vector.shape_cast %72 : vector<2x8xf32> to vector<2x8x1xf32>
    %74 = vector.broadcast %73 : vector<2x8x1xf32> to vector<2x8x8xf32>
    %75 = arith.subf %71, %74 : vector<2x8x8xf32>
    %76 = math.exp %75 : vector<2x8x8xf32>
    %cst_22 = arith.constant dense<0.000000e+00> : vector<2x8xf32>
    %77 = vector.multi_reduction <add>, %76, %cst_22 [2] : vector<2x8x8xf32> to vector<2x8xf32>
    %78 = vector.shape_cast %77 : vector<2x8xf32> to vector<2x8x1xf32>
    %79 = tpu.reciprocal %78 {approx = true} : vector<2x8x1xf32> -> vector<2x8x1xf32>
    %80 = vector.broadcast %79 : vector<2x8x1xf32> to vector<2x8x8xf32>
    %81 = arith.mulf %76, %80 : vector<2x8x8xf32>
    %82 = arith.truncf %81 : vector<2x8x8xf32> to vector<2x8x8xbf16>
    "tpu.trace_start"() <{level = 10 : i32, message = "bqk,bkd->bqd"}> : () -> ()
    %cst_23 = arith.constant dense<0.000000e+00> : vector<2x8x8xf32>
    %83 = tpu.matmul %82, %70, %cst_23 {dimension_numbers = #tpu.dot_dimension_numbers<[2], [1], [1], [2], [0, 0, 0, 1, 1, 2], [0], [0]>} : vector<2x8x8xbf16>, vector<2x8x8xbf16>, vector<2x8x8xf32> -> vector<2x8x8xf32>
    "tpu.trace_stop"() : () -> ()
    %84 = vector.shape_cast %83 : vector<2x8x8xf32> to vector<16x8xf32>
    %c0_24 = arith.constant 0 : index
    %c16 = arith.constant 16 : index
    %85 = vector.load %arg15[%c0_24, %c16] : memref<16x32xf32, #tpu.memory_space<vmem>>, vector<16x8xf32>
    tpu.vector_store %arg15[%c0_24, %c16], %84 {strides = array<i32>} : memref<16x32xf32, #tpu.memory_space<vmem>>, vector<16x8xf32>,
    %86 = vector.extract_strided_slice %7 {offsets = [0, 24], sizes = [16, 8], strides = [1, 1]} : vector<16x96xf32> to vector<16x8xf32>
    %cst_25 = arith.constant 0.353553385 : f32
    %87 = vector.broadcast %cst_25 : f32 to vector<16x8xf32>
    %88 = arith.mulf %86, %87 : vector<16x8xf32>
    %89 = arith.truncf %88 : vector<16x8xf32> to vector<16x8xbf16>
    %90 = vector.shape_cast %89 : vector<16x8xbf16> to vector<2x8x8xbf16>
    %91 = vector.extract_strided_slice %7 {offsets = [0, 56], sizes = [16, 8], strides = [1, 1]} : vector<16x96xf32> to vector<16x8xf32>
    %92 = arith.truncf %91 : vector<16x8xf32> to vector<16x8xbf16>
    %93 = vector.shape_cast %92 : vector<16x8xbf16> to vector<2x8x8xbf16>
    %94 = vector.extract_strided_slice %7 {offsets = [0, 88], sizes = [16, 8], strides = [1, 1]} : vector<16x96xf32> to vector<16x8xf32>
    %95 = arith.truncf %94 : vector<16x8xf32> to vector<16x8xbf16>
    %96 = vector.shape_cast %95 : vector<16x8xbf16> to vector<2x8x8xbf16>
    "tpu.trace_start"() <{level = 10 : i32, message = "bqd,bkd->bqk"}> : () -> ()
    %cst_26 = arith.constant dense<0.000000e+00> : vector<2x8x8xf32>
    %97 = tpu.matmul %90, %93, %cst_26 {dimension_numbers = #tpu.dot_dimension_numbers<[2], [2], [1], [1], [0, 0, 0, 1, 1, 1], [0], [0]>} : vector<2x8x8xbf16>, vector<2x8x8xbf16>, vector<2x8x8xf32> -> vector<2x8x8xf32>
    "tpu.trace_stop"() : () -> ()
    %cst_27 = arith.constant dense<0xFF800000> : vector<2x8xf32>
    %98 = vector.multi_reduction <maximumf>, %97, %cst_27 [2] : vector<2x8x8xf32> to vector<2x8xf32>
    %99 = vector.shape_cast %98 : vector<2x8xf32> to vector<2x8x1xf32>
    %100 = vector.broadcast %99 : vector<2x8x1xf32> to vector<2x8x8xf32>
    %101 = arith.subf %97, %100 : vector<2x8x8xf32>
    %102 = math.exp %101 : vector<2x8x8xf32>
    %cst_28 = arith.constant dense<0.000000e+00> : vector<2x8xf32>
    %103 = vector.multi_reduction <add>, %102, %cst_28 [2] : vector<2x8x8xf32> to vector<2x8xf32>
    %104 = vector.shape_cast %103 : vector<2x8xf32> to vector<2x8x1xf32>
    %105 = tpu.reciprocal %104 {approx = true} : vector<2x8x1xf32> -> vector<2x8x1xf32>
    %106 = vector.broadcast %105 : vector<2x8x1xf32> to vector<2x8x8xf32>
    %107 = arith.mulf %102, %106 : vector<2x8x8xf32>
    %108 = arith.truncf %107 : vector<2x8x8xf32> to vector<2x8x8xbf16>
    "tpu.trace_start"() <{level = 10 : i32, message = "bqk,bkd->bqd"}> : () -> ()
    %cst_29 = arith.constant dense<0.000000e+00> : vector<2x8x8xf32>
    %109 = tpu.matmul %108, %96, %cst_29 {dimension_numbers = #tpu.dot_dimension_numbers<[2], [1], [1], [2], [0, 0, 0, 1, 1, 2], [0], [0]>} : vector<2x8x8xbf16>, vector<2x8x8xbf16>, vector<2x8x8xf32> -> vector<2x8x8xf32>
    "tpu.trace_stop"() : () -> ()
    %110 = vector.shape_cast %109 : vector<2x8x8xf32> to vector<16x8xf32>
    %c0_30 = arith.constant 0 : index
    %c24 = arith.constant 24 : index
    %111 = vector.load %arg15[%c0_30, %c24] : memref<16x32xf32, #tpu.memory_space<vmem>>, vector<16x8xf32>
    tpu.vector_store %arg15[%c0_30, %c24], %110 {strides = array<i32>} : memref<16x32xf32, #tpu.memory_space<vmem>>, vector<16x8xf32>,
    %c0_31 = arith.constant 0 : index
    %c0_32 = arith.constant 0 : index
    %112 = vector.load %arg15[%c0_31, %c0_32] : memref<16x32xf32, #tpu.memory_space<vmem>>, vector<16x32xf32>
    %113 = arith.truncf %112 : vector<16x32xf32> to vector<16x32xbf16>
    %c0_33 = arith.constant 0 : index
    %c0_34 = arith.constant 0 : index
    %114 = vector.load %arg4[%c0_33, %c0_34] : memref<32x32xbf16, #tpu.memory_space<vmem>>, vector<32x32xbf16>
    %cst_35 = arith.constant dense<0.000000e+00> : vector<16x32xf32>
    %115 = tpu.matmul %113, %114, %cst_35 {dimension_numbers = #tpu.dot_dimension_numbers<[1], [0], [0], [1], [0, 0, 1, 1], [], []>} : vector<16x32xbf16>, vector<32x32xbf16>, vector<16x32xf32> -> vector<16x32xf32>
    %c0_36 = arith.constant 0 : index
    %c0_37 = arith.constant 0 : index
    %116 = vector.load %arg5[%c0_36, %c0_37] : memref<1x32xf32, #tpu.memory_space<vmem>>, vector<1x32xf32>
    %117 = vector.broadcast %116 : vector<1x32xf32> to vector<16x32xf32>
    %118 = arith.addf %115, %117 : vector<16x32xf32>
    %119 = arith.addf %1, %118 : vector<16x32xf32>
    %c0_38 = arith.constant 0 : index
    %c0_39 = arith.constant 0 : index
    %120 = vector.load %arg6[%c0_38, %c0_39] : memref<1x32xf32, #tpu.memory_space<vmem>>, vector<1x32xf32>
    %c0_40 = arith.constant 0 : index
    %c0_41 = arith.constant 0 : index
    %121 = vector.load %arg7[%c0_40, %c0_41] : memref<1x32xf32, #tpu.memory_space<vmem>>, vector<1x32xf32>
    %cst_42 = arith.constant dense<0.000000e+00> : vector<16xf32>
    %122 = vector.multi_reduction <add>, %119, %cst_42 [1] : vector<16x32xf32> to vector<16xf32>
    %123 = vector.shape_cast %122 : vector<16xf32> to vector<16x1xf32>
    %cst_43 = arith.constant 3.200000e+01 : f32
    %124 = vector.broadcast %cst_43 : f32 to vector<16x1xf32>
    %125 = arith.divf %123, %124 : vector<16x1xf32>
    %126 = vector.broadcast %125 : vector<16x1xf32> to vector<16x32xf32>
    %127 = arith.subf %119, %126 : vector<16x32xf32>
    %128 = arith.mulf %127, %127 : vector<16x32xf32>
    %cst_44 = arith.constant dense<0.000000e+00> : vector<16xf32>
    %129 = vector.multi_reduction <add>, %128, %cst_44 [1] : vector<16x32xf32> to vector<16xf32>
    %130 = vector.shape_cast %129 : vector<16xf32> to vector<16x1xf32>
    %cst_45 = arith.constant 3.200000e+01 : f32
    %131 = vector.broadcast %cst_45 : f32 to vector<16x1xf32>
    %132 = arith.divf %130, %131 : vector<16x1xf32>
    %133 = vector.broadcast %125 : vector<16x1xf32> to vector<16x32xf32>
    %134 = arith.subf %119, %133 : vector<16x32xf32>
    %cst_46 = arith.constant 9.99999974E-6 : f32
    %135 = vector.broadcast %cst_46 : f32 to vector<16x1xf32>
    %136 = arith.addf %132, %135 : vector<16x1xf32>
    %137 = math.rsqrt %136 : vector<16x1xf32>
    %138 = vector.broadcast %137 : vector<16x1xf32> to vector<16x32xf32>
    %139 = arith.mulf %134, %138 : vector<16x32xf32>
    %140 = vector.broadcast %120 : vector<1x32xf32> to vector<16x32xf32>
    %141 = arith.mulf %139, %140 : vector<16x32xf32>
    %142 = vector.broadcast %121 : vector<1x32xf32> to vector<16x32xf32>
    %143 = arith.addf %141, %142 : vector<16x32xf32>
    %144 = arith.truncf %143 : vector<16x32xf32> to vector<16x32xbf16>
    %c0_47 = arith.constant 0 : index
    %c0_48 = arith.constant 0 : index
    %145 = vector.load %arg8[%c0_47, %c0_48] : memref<32x128xbf16, #tpu.memory_space<vmem>>, vector<32x128xbf16>
    %cst_49 = arith.constant dense<0.000000e+00> : vector<16x128xf32>
    %146 = tpu.matmul %144, %145, %cst_49 {dimension_numbers = #tpu.dot_dimension_numbers<[1], [0], [0], [1], [0, 0, 1, 1], [], []>} : vector<16x32xbf16>, vector<32x128xbf16>, vector<16x128xf32> -> vector<16x128xf32>
    %c0_50 = arith.constant 0 : index
    %c0_51 = arith.constant 0 : index
    %147 = vector.load %arg9[%c0_50, %c0_51] : memref<1x128xf32, #tpu.memory_space<vmem>>, vector<1x128xf32>
    %148 = vector.broadcast %147 : vector<1x128xf32> to vector<16x128xf32>
    %149 = arith.addf %146, %148 : vector<16x128xf32>
    %cst_52 = arith.constant 0.000000e+00 : f32
    %150 = vector.broadcast %cst_52 : f32 to vector<16x128xf32>
    %151 = arith.maximumf %149, %150 : vector<16x128xf32>
    %152 = arith.truncf %151 : vector<16x128xf32> to vector<16x128xbf16>
    %c0_53 = arith.constant 0 : index
    %c0_54 = arith.constant 0 : index
    %153 = vector.load %arg10[%c0_53, %c0_54] : memref<128x32xbf16, #tpu.memory_space<vmem>>, vector<128x32xbf16>
    %cst_55 = arith.constant dense<0.000000e+00> : vector<16x32xf32>
    %154 = tpu.matmul %152, %153, %cst_55 {dimension_numbers = #tpu.dot_dimension_numbers<[1], [0], [0], [1], [0, 0, 1, 1], [], []>} : vector<16x128xbf16>, vector<128x32xbf16>, vector<16x32xf32> -> vector<16x32xf32>
    %c0_56 = arith.constant 0 : index
    %c0_57 = arith.constant 0 : index
    %155 = vector.load %arg11[%c0_56, %c0_57] : memref<1x32xf32, #tpu.memory_space<vmem>>, vector<1x32xf32>
    %156 = vector.broadcast %155 : vector<1x32xf32> to vector<16x32xf32>
    %157 = arith.addf %154, %156 : vector<16x32xf32>
    %158 = arith.addf %143, %157 : vector<16x32xf32>
    %c0_58 = arith.constant 0 : index
    %c0_59 = arith.constant 0 : index
    %159 = vector.load %arg12[%c0_58, %c0_59] : memref<1x32xf32, #tpu.memory_space<vmem>>, vector<1x32xf32>
    %c0_60 = arith.constant 0 : index
    %c0_61 = arith.constant 0 : index
    %160 = vector.load %arg13[%c0_60, %c0_61] : memref<1x32xf32, #tpu.memory_space<vmem>>, vector<1x32xf32>
    %cst_62 = arith.constant dense<0.000000e+00> : vector<16xf32>
    %161 = vector.multi_reduction <add>, %158, %cst_62 [1] : vector<16x32xf32> to vector<16xf32>
    %162 = vector.shape_cast %161 : vector<16xf32> to vector<16x1xf32>
    %cst_63 = arith.constant 3.200000e+01 : f32
    %163 = vector.broadcast %cst_63 : f32 to vector<16x1xf32>
    %164 = arith.divf %162, %163 : vector<16x1xf32>
    %165 = vector.broadcast %164 : vector<16x1xf32> to vector<16x32xf32>
    %166 = arith.subf %158, %165 : vector<16x32xf32>
    %167 = arith.mulf %166, %166 : vector<16x32xf32>
    %cst_64 = arith.constant dense<0.000000e+00> : vector<16xf32>
    %168 = vector.multi_reduction <add>, %167, %cst_64 [1] : vector<16x32xf32> to vector<16xf32>
    %169 = vector.shape_cast %168 : vector<16xf32> to vector<16x1xf32>
    %cst_65 = arith.constant 3.200000e+01 : f32
    %170 = vector.broadcast %cst_65 : f32 to vector<16x1xf32>
    %171 = arith.divf %169, %170 : vector<16x1xf32>
    %172 = vector.broadcast %164 : vector<16x1xf32> to vector<16x32xf32>
    %173 = arith.subf %158, %172 : vector<16x32xf32>
    %cst_66 = arith.constant 9.99999974E-6 : f32
    %174 = vector.broadcast %cst_66 : f32 to vector<16x1xf32>
    %175 = arith.addf %171, %174 : vector<16x1xf32>
    %176 = math.rsqrt %175 : vector<16x1xf32>
    %177 = vector.broadcast %176 : vector<16x1xf32> to vector<16x32xf32>
    %178 = arith.mulf %173, %177 : vector<16x32xf32>
    %179 = vector.broadcast %159 : vector<1x32xf32> to vector<16x32xf32>
    %180 = arith.mulf %178, %179 : vector<16x32xf32>
    %181 = vector.broadcast %160 : vector<1x32xf32> to vector<16x32xf32>
    %182 = arith.addf %180, %181 : vector<16x32xf32>
    %183 = vector.shape_cast %182 : vector<16x32xf32> to vector<2x8x32xf32>
    %c0_67 = arith.constant 0 : index
    %c0_68 = arith.constant 0 : index
    %c0_69 = arith.constant 0 : index
    %184 = vector.load %arg14[%c0_67, %c0_68, %c0_69] : memref<2x8x32xf32, #tpu.memory_space<vmem>>, vector<2x8x32xf32>
    tpu.vector_store %arg14[%c0_67, %c0_68, %c0_69], %183 {strides = array<i32>} : memref<2x8x32xf32, #tpu.memory_space<vmem>>, vector<2x8x32xf32>,
    return
  }
  func.func @transform_0(%arg0: i32) -> (i32, i32, i32) {
    %c0_i32 = arith.constant 0 : i32
    %c0_i32_0 = arith.constant 0 : i32
    %c0_i32_1 = arith.constant 0 : i32
    return %arg0, %c0_i32, %c0_i32_0 : i32, i32, i32
  }
  func.func @transform_1(%arg0: i32) -> (i32, i32) {
    %c0_i32 = arith.constant 0 : i32
    %c0_i32_0 = arith.constant 0 : i32
    %c0_i32_1 = arith.constant 0 : i32
    return %c0_i32, %c0_i32_0 : i32, i32
  }
  func.func @transform_2(%arg0: i32) -> (i32, i32) {
    %c0_i32 = arith.constant 0 : i32
    %c0_i32_0 = arith.constant 0 : i32
    %c0_i32_1 = arith.constant 0 : i32
    return %c0_i32, %c0_i32_0 : i32, i32
  }
  func.func @transform_3(%arg0: i32) -> (i32, i32) {
    %c0_i32 = arith.constant 0 : i32
    %c0_i32_0 = arith.constant 0 : i32
    %c0_i32_1 = arith.constant 0 : i32
    return %c0_i32, %c0_i32_0 : i32, i32
  }
  func.func @transform_4(%arg0: i32) -> (i32, i32) {
    %c0_i32 = arith.constant 0 : i32
    %c0_i32_0 = arith.constant 0 : i32
    %c0_i32_1 = arith.constant 0 : i32
    return %c0_i32, %c0_i32_0 : i32, i32
  }
  func.func @transform_5(%arg0: i32) -> (i32, i32) {
    %c0_i32 = arith.constant 0 : i32
    %c0_i32_0 = arith.constant 0 : i32
    %c0_i32_1 = arith.constant 0 : i32
    return %c0_i32, %c0_i32_0 : i32, i32
  }
  func.func @transform_6(%arg0: i32) -> (i32, i32) {
    %c0_i32 = arith.constant 0 : i32
    %c0_i32_0 = arith.constant 0 : i32
    %c0_i32_1 = arith.constant 0 : i32
    return %c0_i32, %c0_i32_0 : i32, i32
  }
  func.func @transform_7(%arg0: i32) -> (i32, i32) {
    %c0_i32 = arith.constant 0 : i32
    %c0_i32_0 = arith.constant 0 : i32
    %c0_i32_1 = arith.constant 0 : i32
    return %c0_i32, %c0_i32_0 : i32, i32
  }
  func.func @transform_8(%arg0: i32) -> (i32, i32) {
    %c0_i32 = arith.constant 0 : i32
    %c0_i32_0 = arith.constant 0 : i32
    %c0_i32_1 = arith.constant 0 : i32
    return %c0_i32, %c0_i32_0 : i32, i32
  }
  func.func @transform_9(%arg0: i32) -> (i32, i32) {
    %c0_i32 = arith.constant 0 : i32
    %c0_i32_0 = arith.constant 0 : i32
    %c0_i32_1 = arith.constant 0 : i32
    return %c0_i32, %c0_i32_0 : i32, i32
  }
  func.func @transform_10(%arg0: i32) -> (i32, i32) {
    %c0_i32 = arith.constant 0 : i32
    %c0_i32_0 = arith.constant 0 : i32
    %c0_i32_1 = arith.constant 0 : i32
    return %c0_i32, %c0_i32_0 : i32, i32
  }
  func.func @transform_11(%arg0: i32) -> (i32, i32) {
    %c0_i32 = arith.constant 0 : i32
    %c0_i32_0 = arith.constant 0 : i32
    %c0_i32_1 = arith.constant 0 : i32
    return %c0_i32, %c0_i32_0 : i32, i32
  }
  func.func @transform_12(%arg0: i32) -> (i32, i32) {
    %c0_i32 = arith.constant 0 : i32
    %c0_i32_0 = arith.constant 0 : i32
    %c0_i32_1 = arith.constant 0 : i32
    return %c0_i32, %c0_i32_0 : i32, i32
  }
  func.func @transform_13(%arg0: i32) -> (i32, i32, i32) {
    %c0_i32 = arith.constant 0 : i32
    %c0_i32_0 = arith.constant 0 : i32
    %c0_i32_1 = arith.constant 0 : i32
    return %arg0, %c0_i32, %c0_i32_0 : i32, i32, i32
  }
}

</mosaic_0001>

<bundles_post_ra>
// kernel: tpu_custom_call.1
= control target key start
LH: loop header
LB: loop body
LE: loop exit
PB: predicated region body
PF: predicated region fallthrough
CT: control target
= control target key end

     0   :  { %s2733_s0 = inlined_call_operand.vmem [shape: f32[4,8,32], index: 0, kind: input, shape index: {}]   ;;  %s2734_s1 = inlined_call_operand.vmem [shape: bf16[32,96], index: 1, kind: input, shape index: {}]   ;;  %s2735_s2 = inlined_call_operand.vmem [shape: f32[1,96], index: 2, kind: input, shape index: {}]   ;;  %s2736_s3 = inlined_call_operand.vmem [shape: bf16[32,32], index: 3, kind: input, shape index: {}]   ;;  %s2737_s4 = inlined_call_operand.vmem [shape: f32[1,32], index: 4, kind: input, shape index: {}]   ;;  %s2738_s5 = inlined_call_operand.vmem [shape: f32[1,32], index: 5, kind: input, shape index: {}]   ;;  %s2739_s6 = inlined_call_operand.vmem [shape: f32[1,32], index: 6, kind: input, shape index: {}]   ;;  %s2740_s7 = inlined_call_operand.vmem [shape: bf16[32,128], index: 7, kind: input, shape index: {}]   ;;  %s2741_s8 = inlined_call_operand.vmem [shape: f32[1,128], index: 8, kind: input, shape index: {}]   ;;  %s2742_s9 = inlined_call_operand.vmem [shape: bf16[128,32], index: 9, kind: input, shape index: {}]   ;;  %s2743_s10 = inlined_call_operand.vmem [shape: f32[1,32], index: 10, kind: input, shape index: {}]   ;;  %s2744_s11 = inlined_call_operand.vmem [shape: f32[1,32], index: 11, kind: input, shape index: {}]   ;;  %s2745_s12 = inlined_call_operand.vmem [shape: f32[1,32], index: 12, kind: input, shape index: {}]   ;;  %s2746_s13 = inlined_call_operand.hbm [shape: f32[4,8,32], index: 13, kind: output, shape index: {}]  }
   0x1   :  { %2748 = sst [smem:[#allocation6_spill]] %s2733_s0 }
   0x2   :  { %2749 = sst [smem:[#allocation7_spill]] %s2734_s1 }
   0x3   :  { %2750 = sst [smem:[#allocation8_spill]] %s2735_s2 }
   0x4   :  { %2751 = sst [smem:[#allocation9_spill]] %s2736_s3 }
   0x5   :  { %18 = vsyncpa [#allocation4], 0 }
   0x6   :  { %20 = vsyncpa [#allocation4 + $0x1], 0  ;;  %s2379_s25 = smov 0   ;;  %s2381_s26 = smov 0  }
   0x7   :  { %s2383_s27 = smov 0   ;;  %s2385_s28 = smov 0  }
   0x8 LB: > { %s2400_s29 = sadd.s32 4294967295, %s2289_s28   ;;  %s1865_s30 = sadd.s32 4294967294, %s2289_s28   ;;  %s2289_s28 = sphi %s2385_s28, %s2762_s28   ;;  %s2285_s27 = sphi %s2383_s27, %s2761_s27   ;;  %s2281_s26 = sphi %s2381_s26, %s2760_s26   ;;  %s2277_s25 = sphi %s2379_s25, %s2759_s25  }
   0x9   : > { %s2404_s14 = sadd.s32 1, %s2289_s28   ;;  %s311_s15 = sadd.s32 1, %s2285_s27 }
   0xa   : > { %s308_s16 = ssub.s32 %s2289_s28, %s2404_s14  ;;  %p321_p0 = scmp.ne.s32.totalorder %s2285_s27, %s2281_s26 }
   0xb   : > { %p309_p1 = scmp.eq.s32.totalorder %s308_s16, 0  ;;  %p322_p2 = scmp.eq.s32.totalorder %s2400_s29, 1 }
   0xc   : > { %p327_p3 = scmp.ne.s32.totalorder %s2281_s26, %s2277_s25  ;;  %p328_p4 = scmp.eq.s32.totalorder %s1865_s30, 1 }
   0xd   : > { %s2415_s17 = scalar_select %p309_p1, %s2285_s27, %s311_s15  }
   0xe   : > { %p2417_p5 = por %p322_p2, %p321_p0  ;;  %p2421_p6 = por %p328_p4, %p327_p3 }
   0xf   : > { %p1868_p7 = scmp.ge.s32.totalorder %s2289_s28, 1  ;;  %p391_p8 = scmp.lt.s32.totalorder %s2289_s28, 3 }
  0x11   : > { %p392_p9 = pnand %p1868_p7, %p391_p8 }
  0x12   : > { %s2754_s1 = sld [smem:[#allocation7_spill]] (!%p392_p9)  ;;  %v2291_v1 = vmov (!%p392_p9), 0.0   ;;  %vm2292_vm0 = vmmov (!%p392_p9), 0   ;;  %s1870_s24 = sshll.u32 (!%p392_p9), %s2400_s29, 1  ;;  %vm469_vm1 = vcmask (!%p392_p9), 261120   ;;  %vm529_vm2 = vcmask (!%p392_p9), 64512  }
  0x13   : > { %395 = sbr.rel (%p392_p9) target bundleno = 4153 (0x1039), region = 72  ;;  %1977 = vmatprep.subr.bf16.mxu0 (!%p392_p9), %v2291_v1  ;;  %1997 = vmatprep.subr.bf16.mxu1 (!%p392_p9), %v2291_v1  ;;  %p436_p10 = scmp.lt.s32.totalorder (!%p392_p9), %s1870_s24, 3  ;;  %vm654_vm3 = vcmask (!%p392_p9), 1043456   ;;  %vm976_vm4 = vcmask (!%p392_p9), 130112   ;;  %vm1207_vm5 = vcmask (!%p392_p9), 195712   ;;  %vm1438_vm6 = vcmask (!%p392_p9), 261312  }
  0x14   : > { %1981 = vmatprep.mubr.msk.bf16.mxu0 (!%p392_p9), %vm2292_vm0, %v2291_v1  ;;  %1999 = vmatprep.mubr.msk.bf16.mxu1 (!%p392_p9), %vm2292_vm0, %v2291_v1  ;;  %s2755_s0 = sld [smem:[#allocation6_spill]] (!%p392_p9)  ;;  %s2756_s2 = sld [smem:[#allocation8_spill]] (!%p392_p9) }
  0x15   : > { %s2293_s23 = smov (!%p392_p9), 96   ;;  %s2296_s15 = smov (!%p392_p9), 120  }
  0x16   : > { %s2297_s16 = smov (!%p392_p9), 56   ;;  %s2299_s21 = smov (!%p392_p9), 112  }
  0x17   : > { %s2300_s22 = smov (!%p392_p9), 48   ;;  %s2757_s3 = sld [smem:[#allocation9_spill]] (!%p392_p9) }
  0x18   : > { %v2173_v0 = vld [vmem:[%s2754_s1] sm:$0xff] (!%p392_p9)   ;;  %v2174_v2 = vld [vmem:[%s2754_s1 + $0x8] sm:$0xff] (!%p392_p9)   ;;  %s2307_s1 = smov (!%p392_p9), [#allocation3]  }
  0x19   : > { %1978 = vmatpush3.bf16.msra.mxu0 (!%p392_p9), %v2173_v0 }
  0x1a   : > { %1979 = vmatprep.subr.bf16.mxu0 %v2291_v1  ;;  %s2764_s24 = smov (!%p436_p10, %s1870_s24), 3  ;;  %v1872_v6 = vld [vmem:[%s2756_s2] ss:$0 sm:$0xff]  ;;  %s2231_s2 = sshll.u32 %s2307_s1, 4  ;;  %s2232_s2 = int_to_ptr.vmem [resolvable:$false] %s2231_s2 }
  0x1b   : > { %s1871_s30 = sshll.u32 %s2764_s24, 3  ;;  %s2294_s24 = smov 64  }
  0x1c   : > { %s439_s20 = scalar_lea.vmem %s2755_s0, %s1871_s30  ;;  %s2295_s30 = smov 88  }
  0x1d   : > { %1980 = vmatpush3.bf16.msra.mxu0 %v2174_v2  ;;  %v2445_v3 = vld [vmem:[%s439_s20] sm:$0xff]  ;;  %v2447_v4 = vld [vmem:[%s439_s20 + $0x8] sm:$0xff]  ;;  %s2298_s20 = smov 80  }
  0x1e   : > { %1985 = vmatprep.subr.bf16.mxu0 %v2291_v1  ;;  %v445_v5 = vpack.c.bf16 %v2447_v4, %v2445_v3 }
  0x20   : > { %1982 = vmatmul.mubr.msk.bf16.vlgmr.msra.gmra.mrb[0].mxu0 %vm469_vm1, %v445_v5 }
  0x21   : > { %1987 = vmatprep.mubr.msk.bf16.mxu0 %vm2292_vm0, %v2291_v1 }
  0xf3   : > { %v507_v7 = vpop.f32.mrb[0].mxu0 }
  0xf4   : > { %v508_v8 = vadd.f32 %v1872_v6, %v507_v7  ;;  %v1983_v9 = vpop.f32.mrb[1].mxu0 }
  0xf5   : > { %v510_v10 = vpop.f32.mrb[2].mxu0 }
  0xf6   : > { %v2457_v11 = vpack.c.bf16 %v508_v8, %v508_v8  ;;  %v511_v12 = vadd.f32 %v1872_v6, %v510_v10  ;;  %v1984_v13 = vpop.f32.mrb[3].mxu0  ;;  %v514_v17 = vmul.f32 0.35355338, %v508_v8 }
  0xf8   : > { %527 = vrot.lane.b32.xlu0 %v2457_v11, %s2293_s23  ;;  %v2460_v14 = vpack.c.bf16 %v511_v12, %v511_v12  ;;  %v2465_v19 = vpack.c.bf16 %v514_v17, %v514_v17  ;;  %v515_v21 = vmul.f32 0.35355338, %v511_v12 }
  0xfa   : > { %v2473_v22 = vpack.c.bf16 %v515_v21, %v515_v21 }
  0xfc   : > { %577 = vrot.lane.b32.xlu0 %v2460_v14, %s2293_s23  ;;  %s2301_s23 = smov 72  }
 0x16a   : > { %v528_v15 = vpop.permute.xlu0 %527 }
 0x16b   : > { %v534_v16 = vsel %vm529_vm2, %v528_v15, 0 }
 0x16c   : > { %1986 = vmatpush3.bf16.xpose.msra.mxu0 %v534_v16 }
 0x16d   : > { %1991 = vmatprep.subr.bf16.mxu0 %v2291_v1 }
 0x16e   : > { %v578_v18 = vpop.permute.xlu0 %577 }
 0x16f   : > { %v583_v20 = vsel %vm529_vm2, %v578_v18, 0 }
 0x173   : > { %1988 = vmatmul.mubr.msk.bf16.vlgmr.msra.gmra.mrb[4].mxu0 %vm529_vm2, %v2465_v19 }
 0x174   : > { %1992 = vmatpush3.bf16.xpose.msra.mxu0 %v583_v20  ;;  %1993 = vmatprep.mubr.msk.bf16.mxu0 %vm2292_vm0, %v2291_v1 }
 0x175   : > { %2003 = vmatprep.subr.bf16.mxu0 %v2291_v1 }
 0x17b   : > { %1994 = vmatmul.mubr.msk.bf16.vlgmr.msra.gmra.mrb[8].mxu0 %vm529_vm2, %v2473_v22 }
 0x17c   : > { %2005 = vmatprep.mubr.msk.bf16.mxu0 %vm2292_vm0, %v2291_v1 }
 0x246   : > { %v570_v23 = vpop.f32.mrb[4].mxu0 }
 0x247   : > { %v1989_v24 = vpop.f32.mrb[5].mxu0  ;;  %v625_v25 = vsel %vm529_vm2, %v570_v23, -inf }
 0x248   : > { %626 = vmax.xlane.f32.xlu1 %v625_v25  ;;  %v573_v26 = vpop.f32.mrb[6].mxu0 }
 0x249   : > { %v1990_v27 = vpop.f32.mrb[7].mxu0 }
 0x24e   : > { %v619_v28 = vpop.f32.mrb[8].mxu0 }
 0x24f   : > { %v1995_v29 = vpop.f32.mrb[9].mxu0  ;;  %v628_v30 = vsel %vm529_vm2, %v619_v28, -inf }
 0x250   : > { %629 = vmax.xlane.f32.xlu1 %v628_v30  ;;  %v622_v31 = vpop.f32.mrb[10].mxu0 }
 0x251   : > { %v1996_v32 = vpop.f32.mrb[11].mxu0 }
 0x261   : > { %649 = vrot.lane.b32.xlu1 %v2457_v11, %s2294_s24 }
 0x265   : > { %698 = vrot.lane.b32.xlu1 %v2460_v14, %s2294_s24  ;;  %s2302_s24 = smov 104  }
 0x269   : > { %750 = vrot.lane.b32.xlu1 %v2457_v11, %s2295_s30 }
 0x2d5   : > { %v627_v33 = vpop.xlane.xlu1 %626 }
 0x2d6   : > { %v631_v34 = vsub.f32 %v570_v23, %v627_v33 }
 0x2d8   : > { %v633_v35 = vmul.f32 1.442695, %v631_v34 }
 0x2da   : > { %2187 = vpow2.f32 %v633_v35 }
 0x2dd   : > { %v630_v36 = vpop.xlane.xlu1 %629 }
 0x2de   : > { %v632_v37 = vsub.f32 %v619_v28, %v630_v36 }
 0x2e0   : > { %v635_v38 = vmul.f32 1.442695, %v632_v37 }
 0x2e1   : > { %v650_v39 = vpop.permute.xlu1 %649 }
 0x2e2   : > { %2189 = vpow2.f32 %v635_v38  ;;  %v656_v40 = vsel %vm654_vm3, %v650_v39, 0 }
 0x2e3   : > { %1998 = vmatpush3.bf16.msra.mxu1 %v656_v40 }
 0x2e4   : > { %v2188_v41 = vpop.eup %2187  ;;  %2009 = vmatprep.subr.bf16.mxu1 %v2291_v1 }
 0x2e5   : > { %v699_v42 = vpop.permute.xlu1 %698  ;;  %v637_v43 = vsel %vm529_vm2, %v2188_v41, 0.0 }
 0x2e6   : > { %v704_v44 = vsel %vm654_vm3, %v699_v42, 0  ;;  %638 = vadd.xlane.f32.xlu0 %v637_v43 }
 0x2e7   : > { %2004 = vmatpush3.bf16.msra.mxu0 %v704_v44 }
 0x2e8   : > { %2015 = vmatprep.subr.bf16.mxu0 %v2291_v1 }
 0x2e9   : > { %v751_v48 = vpop.permute.xlu1 %750 }
 0x2ea   : > { %v756_v53 = vsel %vm529_vm2, %v751_v48, 0 }
 0x2ec   : > { %v2190_v45 = vpop.eup %2189 }
 0x2ed   : > { %v640_v46 = vsel %vm529_vm2, %v2190_v45, 0.0 }
 0x2ee   : > { %641 = vadd.xlane.f32.xlu1 %v640_v46 }
 0x2fc   : > { %748 = vrot.lane.b32.xlu0 %v2465_v19, %s2296_s15 }
 0x2ff   : > { %800 = vrot.lane.b32.xlu1 %v2460_v14, %s2295_s30  ;;  %s2303_s30 = smov 40  }
 0x303   : > { %798 = vrot.lane.b32.xlu1 %v2473_v22, %s2296_s15  ;;  %s2747_s15 = smov 8  }
 0x373   : > { %v639_v47 = vpop.xlane.xlu0 %638 }
 0x374   : > { %2191 = vrcp.f32 %v639_v47 }
 0x377   : > { %v749_v58 = vpop.permute.xlu0 %748 }
 0x37b   : > { %v642_v49 = vpop.xlane.xlu1 %641 }
 0x37c   : > { %2193 = vrcp.f32 %v642_v49 }
 0x37e   : > { %v2192_v50 = vpop.eup %2191 }
 0x37f   : > { %v645_v51 = vmul.f32 %v2192_v50, %v2188_v41  ;;  %v801_v56 = vpop.permute.xlu1 %800 }
 0x380   : > { %v806_v59 = vsel %vm529_vm2, %v801_v56, 0 }
 0x381   : > { %v647_v52 = vpack.c.bf16 %v645_v51, %v645_v51 }
 0x383   : > { %2000 = vmatmul.mubr.msk.bf16.vlgmr.msra.gmra.mrb[0].mxu1 %vm529_vm2, %v647_v52  ;;  %v799_v60 = vpop.permute.xlu1 %798 }
 0x384   : > { %2010 = vmatpush3.bf16.xpose.msra.mxu1 %v756_v53  ;;  %2011 = vmatprep.mubr.msk.bf16.mxu1 %vm2292_vm0, %v2291_v1 }
 0x385   : > { %2021 = vmatprep.subr.bf16.mxu1 %v2291_v1 }
 0x386   : > { %v2194_v54 = vpop.eup %2193 }
 0x387   : > { %v646_v55 = vmul.f32 %v2194_v54, %v2190_v45 }
 0x389   : > { %v648_v57 = vpack.c.bf16 %v646_v55, %v646_v55 }
 0x38b   : > { %2006 = vmatmul.mubr.msk.bf16.vlgmr.msra.gmra.mrb[12].mxu0 %vm529_vm2, %v648_v57  ;;  %2012 = vmatmul.mubr.msk.bf16.vlgmr.msra.gmra.mrb[4].mxu1 %vm529_vm2, %v749_v58 }
 0x38c   : > { %2016 = vmatpush3.bf16.xpose.msra.mxu0 %v806_v59  ;;  %2017 = vmatprep.mubr.msk.bf16.mxu0 %vm2292_vm0, %v2291_v1 }
 0x38d   : > { %2027 = vmatprep.subr.bf16.mxu0 %v2291_v1  ;;  %2023 = vmatprep.mubr.msk.bf16.mxu1 %vm2292_vm0, %v2291_v1 }
 0x393   : > { %2018 = vmatmul.mubr.msk.bf16.vlgmr.msra.gmra.mrb[16].mxu0 %vm529_vm2, %v799_v60 }
 0x394   : > { %2029 = vmatprep.mubr.msk.bf16.mxu0 %vm2292_vm0, %v2291_v1 }
 0x456   : > { %v692_v61 = vpop.f32.mrb[0].mxu1 }
 0x457   : > { %746 = vst.msk [vmem:[#allocation2] sm:$0xff] %vm529_vm2, %v692_v61  ;;  %v2001_v62 = vpop.f32.mrb[1].mxu1 }
 0x458   : > { %v695_v63 = vpop.f32.mrb[2].mxu1 }
 0x459   : > { %v2002_v0 = vpop.f32.mrb[3].mxu1 }
 0x45e   : > { %v740_v2 = vpop.f32.mrb[12].mxu0  ;;  %v792_v5 = vpop.f32.mrb[4].mxu1 }
 0x45f   : > { %747 = vst.msk [vmem:[#allocation2 + $0x8] sm:$0xff] %vm529_vm2, %v740_v2  ;;  %v2007_v6 = vpop.f32.mrb[13].mxu0  ;;  %v2013_v7 = vpop.f32.mrb[5].mxu1  ;;  %v848_v8 = vsel %vm529_vm2, %v792_v5, -inf }
 0x460   : > { %849 = vmax.xlane.f32.xlu1 %v848_v8  ;;  %v743_v9 = vpop.f32.mrb[14].mxu0  ;;  %v795_v10 = vpop.f32.mrb[6].mxu1 }
 0x461   : > { %v2008_v12 = vpop.f32.mrb[15].mxu0  ;;  %v2014_v13 = vpop.f32.mrb[7].mxu1 }
 0x466   : > { %v842_v15 = vpop.f32.mrb[16].mxu0 }
 0x467   : > { %v2019_v16 = vpop.f32.mrb[17].mxu0  ;;  %v851_v17 = vsel %vm529_vm2, %v842_v15, -inf }
 0x468   : > { %852 = vmax.xlane.f32.xlu0 %v851_v17  ;;  %v845_v18 = vpop.f32.mrb[18].mxu0 }
 0x469   : > { %v2020_v20 = vpop.f32.mrb[19].mxu0 }
 0x471   : > { %872 = vrot.lane.b32.xlu1 %v2457_v11, %s2297_s16 }
 0x475   : > { %981 = vrot.lane.b32.xlu1 %v2457_v11, %s2298_s20 }
 0x47e   : > { %920 = vrot.lane.b32.xlu0 %v2460_v14, %s2297_s16  ;;  %s2305_s16 = smov 16  }
 0x482   : > { %979 = vrot.lane.b32.xlu0 %v2465_v19, %s2299_s21 }
 0x4ed   : > { %v850_v21 = vpop.xlane.xlu1 %849 }
 0x4ee   : > { %v854_v23 = vsub.f32 %v792_v5, %v850_v21 }
 0x4f0   : > { %v856_v24 = vmul.f32 1.442695, %v854_v23 }
 0x4f1   : > { %v873_v25 = vpop.permute.xlu1 %872 }
 0x4f2   : > { %2195 = vpow2.f32 %v856_v24  ;;  %v878_v26 = vsel %vm654_vm3, %v873_v25, 0 }
 0x4f3   : > { %2022 = vmatpush3.bf16.msra.mxu1 %v878_v26 }
 0x4f4   : > { %2033 = vmatprep.subr.bf16.mxu1 %v2291_v1 }
 0x4f5   : > { %v853_v27 = vpop.xlane.xlu0 %852  ;;  %v982_v36 = vpop.permute.xlu1 %981 }
 0x4f6   : > { %v855_v28 = vsub.f32 %v842_v15, %v853_v27  ;;  %v987_v42 = vsel %vm529_vm2, %v982_v36, 0 }
 0x4f8   : > { %v858_v29 = vmul.f32 1.442695, %v855_v28 }
 0x4f9   : > { %v921_v30 = vpop.permute.xlu0 %920 }
 0x4fa   : > { %2197 = vpow2.f32 %v858_v29  ;;  %v926_v31 = vsel %vm654_vm3, %v921_v30, 0 }
 0x4fb   : > { %2028 = vmatpush3.bf16.msra.mxu0 %v926_v31 }
 0x4fc   : > { %v2196_v32 = vpop.eup %2195  ;;  %2039 = vmatprep.subr.bf16.mxu0 %v2291_v1 }
 0x4fd   : > { %v860_v33 = vsel %vm529_vm2, %v2196_v32, 0.0  ;;  %v980_v47 = vpop.permute.xlu0 %979 }
 0x4fe   : > { %861 = vadd.xlane.f32.xlu1 %v860_v33 }
 0x504   : > { %v2198_v34 = vpop.eup %2197 }
 0x505   : > { %v863_v35 = vsel %vm529_vm2, %v2198_v34, 0.0 }
 0x506   : > { %864 = vadd.xlane.f32.xlu1 %v863_v35 }
 0x517   : > { %1031 = vrot.lane.b32.xlu1 %v2460_v14, %s2298_s20 }
 0x51b   : > { %1029 = vrot.lane.b32.xlu1 %v2473_v22, %s2299_s21 }
 0x58b   : > { %v862_v37 = vpop.xlane.xlu1 %861 }
 0x58c   : > { %2199 = vrcp.f32 %v862_v37 }
 0x593   : > { %v865_v38 = vpop.xlane.xlu1 %864 }
 0x594   : > { %2201 = vrcp.f32 %v865_v38 }
 0x596   : > { %v2200_v39 = vpop.eup %2199 }
 0x597   : > { %v868_v40 = vmul.f32 %v2200_v39, %v2196_v32  ;;  %v1032_v45 = vpop.permute.xlu1 %1031 }
 0x598   : > { %v1037_v48 = vsel %vm529_vm2, %v1032_v45, 0 }
 0x599   : > { %v870_v41 = vpack.c.bf16 %v868_v40, %v868_v40 }
 0x59b   : > { %2024 = vmatmul.mubr.msk.bf16.vlgmr.msra.gmra.mrb[8].mxu1 %vm529_vm2, %v870_v41  ;;  %v1030_v49 = vpop.permute.xlu1 %1029 }
 0x59c   : > { %2034 = vmatpush3.bf16.xpose.msra.mxu1 %v987_v42  ;;  %2035 = vmatprep.mubr.msk.bf16.mxu1 %vm2292_vm0, %v2291_v1 }
 0x59d   : > { %2045 = vmatprep.subr.bf16.mxu1 %v2291_v1 }
 0x59e   : > { %v2202_v43 = vpop.eup %2201 }
 0x59f   : > { %v869_v44 = vmul.f32 %v2202_v43, %v2198_v34 }
 0x5a1   : > { %v871_v46 = vpack.c.bf16 %v869_v44, %v869_v44 }
 0x5a3   : > { %2030 = vmatmul.mubr.msk.bf16.vlgmr.msra.gmra.mrb[20].mxu0 %vm529_vm2, %v871_v46  ;;  %2036 = vmatmul.mubr.msk.bf16.vlgmr.msra.gmra.mrb[12].mxu1 %vm529_vm2, %v980_v47 }
 0x5a4   : > { %2040 = vmatpush3.bf16.xpose.msra.mxu0 %v1037_v48  ;;  %2041 = vmatprep.mubr.msk.bf16.mxu0 %vm2292_vm0, %v2291_v1 }
 0x5a5   : > { %2051 = vmatprep.subr.bf16.mxu0 %v2291_v1  ;;  %2047 = vmatprep.mubr.msk.bf16.mxu1 %vm2292_vm0, %v2291_v1 }
 0x5ab   : > { %2042 = vmatmul.mubr.msk.bf16.vlgmr.msra.gmra.mrb[24].mxu0 %vm529_vm2, %v1030_v49 }
 0x5ac   : > { %2053 = vmatprep.mubr.msk.bf16.mxu0 %vm2292_vm0, %v2291_v1 }
 0x66e   : > { %v2541_v50 = vpop.f32.mrb[8].mxu1 }
 0x66f   : > { %v2025_v51 = vpop.f32.mrb[9].mxu1 }
 0x670   : > { %v917_v52 = vpop.f32.mrb[10].mxu1 }
 0x671   : > { %v2026_v53 = vpop.f32.mrb[11].mxu1 }
 0x676   : > { %v2543_v54 = vpop.f32.mrb[20].mxu0  ;;  %v1023_v55 = vpop.f32.mrb[12].mxu1 }
 0x677   : > { %v2031_v56 = vpop.f32.mrb[21].mxu0  ;;  %v2037_v57 = vpop.f32.mrb[13].mxu1  ;;  %v1079_v58 = vsel %vm529_vm2, %v1023_v55, -inf }
 0x678   : > { %1080 = vmax.xlane.f32.xlu0 %v1079_v58  ;;  %v965_v59 = vpop.f32.mrb[22].mxu0  ;;  %v1026_v60 = vpop.f32.mrb[14].mxu1 }
 0x679   : > { %v2032_v61 = vpop.f32.mrb[23].mxu0  ;;  %v2038_v62 = vpop.f32.mrb[15].mxu1 }
 0x67e   : > { %v1073_v63 = vpop.f32.mrb[24].mxu0 }
 0x67f   : > { %v2043_v0 = vpop.f32.mrb[25].mxu0  ;;  %v1082_v2 = vsel %vm529_vm2, %v1073_v63, -inf }
 0x680   : > { %1083 = vmax.xlane.f32.xlu1 %v1082_v2  ;;  %v1076_v5 = vpop.f32.mrb[26].mxu0 }
 0x681   : > { %v2044_v6 = vpop.f32.mrb[27].mxu0 }
 0x691   : > { %1103 = vrot.lane.b32.xlu1 %v2457_v11, %s2300_s22 }
 0x695   : > { %1212 = vrot.lane.b32.xlu1 %v2457_v11, %s2301_s23 }
 0x699   : > { %1262 = vrot.lane.b32.xlu1 %v2460_v14, %s2301_s23 }
 0x69d   : > { %1260 = vrot.lane.b32.xlu1 %v2473_v22, %s2302_s24 }
 0x705   : > { %v1081_v7 = vpop.xlane.xlu0 %1080 }
 0x706   : > { %v1085_v8 = vsub.f32 %v1023_v55, %v1081_v7 }
 0x708   : > { %v1087_v9 = vmul.f32 1.442695, %v1085_v8 }
 0x70a   : > { %2203 = vpow2.f32 %v1087_v9 }
 0x70d   : > { %v1084_v10 = vpop.xlane.xlu1 %1083 }
 0x70e   : > { %v1086_v12 = vsub.f32 %v1073_v63, %v1084_v10 }
 0x710   : > { %v1089_v13 = vmul.f32 1.442695, %v1086_v12 }
 0x711   : > { %v1104_v15 = vpop.permute.xlu1 %1103 }
 0x712   : > { %2205 = vpow2.f32 %v1089_v13  ;;  %v1109_v16 = vsel %vm654_vm3, %v1104_v15, 0 }
 0x713   : > { %2046 = vmatpush3.bf16.msra.mxu1 %v1109_v16 }
 0x714   : > { %v2204_v17 = vpop.eup %2203  ;;  %2057 = vmatprep.subr.bf16.mxu1 %v2291_v1 }
 0x715   : > { %v1091_v18 = vsel %vm529_vm2, %v2204_v17, 0.0  ;;  %v1213_v27 = vpop.permute.xlu1 %1212 }
 0x716   : > { %1092 = vadd.xlane.f32.xlu0 %v1091_v18  ;;  %v1218_v30 = vsel %vm529_vm2, %v1213_v27, 0 }
 0x719   : > { %v1263_v32 = vpop.permute.xlu1 %1262 }
 0x71a   : > { %v1268_v35 = vsel %vm529_vm2, %v1263_v32, 0 }
 0x71c   : > { %v2206_v20 = vpop.eup %2205 }
 0x71d   : > { %v1094_v22 = vsel %vm529_vm2, %v2206_v20, 0.0  ;;  %v1261_v36 = vpop.permute.xlu1 %1260 }
 0x71e   : > { %1095 = vadd.xlane.f32.xlu0 %v1094_v22  ;;  %v2175_v22 = vld [vmem:[%s2757_s3] sm:$0xff]  }
 0x734   : > { %1151 = vrot.lane.b32.xlu0 %v2460_v14, %s2300_s22  ;;  %s1926_s22 = sshll.u32 %s2400_s29, 8 }
 0x738   : > { %1210 = vrot.lane.b32.xlu0 %v2465_v19, %s2302_s24  ;;  %s2306_s24 = smov 24  }
 0x7a3   : > { %v1093_v21 = vpop.xlane.xlu0 %1092 }
 0x7a4   : > { %2207 = vrcp.f32 %v1093_v21  ;;  %v2176_v21 = vld [vmem:[%s2757_s3 + $0x8] sm:$0xff]   ;;  %s2685_s3 = scalar_lea.hbm %s2746_s13, %s1926_s22 }
 0x7ab   : > { %v1096_v23 = vpop.xlane.xlu0 %1095 }
 0x7ac   : > { %2209 = vrcp.f32 %v1096_v23 }
 0x7ae   : > { %v2208_v24 = vpop.eup %2207 }
 0x7af   : > { %v1099_v25 = vmul.f32 %v2208_v24, %v2204_v17  ;;  %v1152_v26 = vpop.permute.xlu0 %1151 }
 0x7b0   : > { %v1157_v28 = vsel %vm654_vm3, %v1152_v26, 0 }
 0x7b1   : > { %2052 = vmatpush3.bf16.msra.mxu0 %v1157_v28  ;;  %v1101_v29 = vpack.c.bf16 %v1099_v25, %v1099_v25 }
 0x7b2   : > { %2063 = vmatprep.subr.bf16.mxu0 %v2291_v1 }
 0x7b3   : > { %2048 = vmatmul.mubr.msk.bf16.vlgmr.msra.gmra.mrb[16].mxu1 %vm529_vm2, %v1101_v29  ;;  %v1211_v34 = vpop.permute.xlu0 %1210 }
 0x7b4   : > { %2058 = vmatpush3.bf16.xpose.msra.mxu1 %v1218_v30  ;;  %2059 = vmatprep.mubr.msk.bf16.mxu1 %vm2292_vm0, %v2291_v1 }
 0x7b5   : > { %2069 = vmatprep.subr.bf16.mxu1 %v2291_v1 }
 0x7b6   : > { %v2210_v19 = vpop.eup %2209 }
 0x7b7   : > { %v1100_v31 = vmul.f32 %v2210_v19, %v2206_v20 }
 0x7b9   : > { %v1102_v33 = vpack.c.bf16 %v1100_v31, %v1100_v31 }
 0x7bb   : > { %2054 = vmatmul.mubr.msk.bf16.vlgmr.msra.gmra.mrb[28].mxu0 %vm529_vm2, %v1102_v33  ;;  %2060 = vmatmul.mubr.msk.bf16.vlgmr.msra.gmra.mrb[20].mxu1 %vm529_vm2, %v1211_v34 }
 0x7bc   : > { %2064 = vmatpush3.bf16.xpose.msra.mxu0 %v1268_v35  ;;  %2065 = vmatprep.mubr.msk.bf16.mxu0 %vm2292_vm0, %v2291_v1  ;;  %v1896_v35 = vld [vmem:[%s2737_s4] ss:$0 sm:$0xff] }
 0x7bd   : > { %2075 = vmatprep.subr.bf16.mxu0 %v2291_v1  ;;  %2071 = vmatprep.mubr.msk.bf16.mxu1 %vm2292_vm0, %v2291_v1 }
 0x7c3   : > { %2066 = vmatmul.mubr.msk.bf16.vlgmr.msra.gmra.mrb[32].mxu0 %vm529_vm2, %v1261_v36 }
 0x7c4   : > { %2077 = vmatprep.mubr.msk.bf16.mxu0 %vm2292_vm0, %v2291_v1 }
 0x886   : > { %v1145_v37 = vpop.f32.mrb[16].mxu1 }
 0x887   : > { %v2049_v38 = vpop.f32.mrb[17].mxu1 }
 0x888   : > { %v1148_v39 = vpop.f32.mrb[18].mxu1 }
 0x889   : > { %v2050_v40 = vpop.f32.mrb[19].mxu1 }
 0x88e   : > { %v1193_v41 = vpop.f32.mrb[28].mxu0  ;;  %v1254_v42 = vpop.f32.mrb[20].mxu1 }
 0x88f   : > { %v2055_v43 = vpop.f32.mrb[29].mxu0  ;;  %v2061_v44 = vpop.f32.mrb[21].mxu1  ;;  %v1310_v45 = vsel %vm529_vm2, %v1254_v42, -inf }
 0x890   : > { %1311 = vmax.xlane.f32.xlu0 %v1310_v45  ;;  %v1196_v46 = vpop.f32.mrb[30].mxu0  ;;  %v1257_v47 = vpop.f32.mrb[22].mxu1 }
 0x891   : > { %v2056_v48 = vpop.f32.mrb[31].mxu0  ;;  %v2062_v49 = vpop.f32.mrb[23].mxu1 }
 0x896   : > { %v1304_v51 = vpop.f32.mrb[32].mxu0 }
 0x897   : > { %v2067_v52 = vpop.f32.mrb[33].mxu0  ;;  %v1313_v53 = vsel %vm529_vm2, %v1304_v51, -inf }
 0x898   : > { %1314 = vmax.xlane.f32.xlu1 %v1313_v53  ;;  %v1307_v55 = vpop.f32.mrb[34].mxu0 }
 0x899   : > { %v2068_v56 = vpop.f32.mrb[35].mxu0 }
 0x8a9   : > { %1334 = vrot.lane.b32.xlu1 %v2457_v11, %s2303_s30 }
 0x8ad   : > { %970 = vrot.lane.b32.xlu1 %v2541_v50, %s2747_s15 }
 0x8b1   : > { %972 = vrot.lane.b32.xlu1 %v2543_v54, %s2747_s15 }
 0x8b5   : > { %1203 = vrot.lane.b32.xlu1 %v1193_v41, %s2305_s16 }
 0x91d   : > { %v1312_v57 = vpop.xlane.xlu0 %1311 }
 0x91e   : > { %v1316_v58 = vsub.f32 %v1254_v42, %v1312_v57  ;;  %v2178_v57 = vld [vmem:[%s2740_s7 + $0x8] sm:$0xff]  }
 0x920   : > { %v1318_v59 = vmul.f32 1.442695, %v1316_v58  ;;  %v2179_v58 = vld [vmem:[%s2742_s9] sm:$0xff]  }
 0x922   : > { %2211 = vpow2.f32 %v1318_v59  ;;  %v2180_v59 = vld [vmem:[%s2742_s9 + $0x8] sm:$0xff]  }
 0x925   : > { %v1315_v60 = vpop.xlane.xlu1 %1314 }
 0x926   : > { %v1317_v61 = vsub.f32 %v1304_v51, %v1315_v60  ;;  %v2181_v60 = vld [vmem:[%s2742_s9 + $0x10] sm:$0xff]  }
 0x928   : > { %v1320_v62 = vmul.f32 1.442695, %v1317_v61  ;;  %v2182_v61 = vld [vmem:[%s2742_s9 + $0x18] sm:$0xff]  }
 0x929   : > { %v1335_v63 = vpop.permute.xlu1 %1334 }
 0x92a   : > { %2213 = vpow2.f32 %v1320_v62  ;;  %v1340_v11 = vsel %vm654_vm3, %v1335_v63, 0  ;;  %v2183_v62 = vld [vmem:[%s2742_s9 + $0x20] sm:$0xff]   ;;  %v2184_v63 = vld [vmem:[%s2742_s9 + $0x28] sm:$0xff]  }
 0x92b   : > { %2070 = vmatpush3.bf16.msra.mxu1 %v1340_v11 }
 0x92c   : > { %v2212_v0 = vpop.eup %2211  ;;  %2081 = vmatprep.subr.bf16.mxu1 %v2291_v1 }
 0x92d   : > { %v971_v50 = vpop.permute.xlu1 %970  ;;  %v1322_v54 = vsel %vm529_vm2, %v2212_v0, 0.0 }
 0x92e   : > { %977 = vst.msk [vmem:[#allocation2] sm:$0xff] %vm976_vm4, %v971_v50  ;;  %1323 = vadd.xlane.f32.xlu0 %v1322_v54 }
 0x931   : > { %v973_v2 = vpop.permute.xlu1 %972 }
 0x932   : > { %978 = vst.msk [vmem:[#allocation2 + $0x8] sm:$0xff] %vm976_vm4, %v973_v2 }
 0x934   : > { %v2214_v5 = vpop.eup %2213 }
 0x935   : > { %v1204_v6 = vpop.permute.xlu1 %1203  ;;  %v1325_v7 = vsel %vm529_vm2, %v2214_v5, 0.0 }
 0x936   : > { %1209 = vst.msk [vmem:[#allocation2 + $0x8] sm:$0xff] %vm1207_vm5, %v1204_v6  ;;  %1326 = vadd.xlane.f32.xlu0 %v1325_v7 }
 0x94c   : > { %1382 = vrot.lane.b32.xlu0 %v2460_v14, %s2303_s30  ;;  %s2233_s30 = scalar_lea.vmem %s2232_s2, 512 }
 0x950   : > { %1201 = vrot.lane.b32.xlu0 %v1145_v37, %s2305_s16 }
 0x9bb   : > { %v1324_v8 = vpop.xlane.xlu0 %1323 }
 0x9bc   : > { %2215 = vrcp.f32 %v1324_v8  ;;  %v1900_v8 = vld [vmem:[%s2738_s5] ss:$0 sm:$0xff] }
 0x9c3   : > { %v1327_v9 = vpop.xlane.xlu0 %1326 }
 0x9c4   : > { %2217 = vrcp.f32 %v1327_v9 }
 0x9c6   : > { %v2216_v10 = vpop.eup %2215 }
 0x9c7   : > { %v1330_v12 = vmul.f32 %v2216_v10, %v2212_v0  ;;  %v1383_v13 = vpop.permute.xlu0 %1382 }
 0x9c8   : > { %v1388_v15 = vsel %vm654_vm3, %v1383_v13, 0  ;;  %v1901_v13 = vld [vmem:[%s2739_s6] ss:$0 sm:$0xff] }
 0x9c9   : > { %2076 = vmatpush3.bf16.msra.mxu0 %v1388_v15  ;;  %v1332_v16 = vpack.c.bf16 %v1330_v12, %v1330_v12 }
 0x9ca   : > { %2089 = vmatprep.subr.bf16.mxu0 %v2291_v1 }
 0x9cb   : > { %v1202_v17 = vpop.permute.xlu0 %1201  ;;  %2072 = vmatmul.mubr.msk.bf16.vlgmr.msra.gmra.mrb[24].mxu1 %vm529_vm2, %v1332_v16 }
 0x9cc   : > { %1208 = vst.msk [vmem:[#allocation2] sm:$0xff] %vm1207_vm5, %v1202_v17  ;;  %2085 = vmatprep.mubr.msk.bf16.mxu1 %vm2292_vm0, %v2291_v1  ;;  %2082 = vmatpush3.bf16.msra.mxu1 %v2175_v22  ;;  %v1902_v22 = vld [vmem:[%s2741_s8] ss:$0 sm:$0xff] }
 0x9cd   : > { %2083 = vmatprep.subr.bf16.mxu1 %v2291_v1 }
 0x9ce   : > { %v2218_v14 = vpop.eup %2217 }
 0x9cf   : > { %v1331_v18 = vmul.f32 %v2218_v14, %v2214_v5 }
 0x9d0   : > { %2084 = vmatpush3.bf16.msra.mxu1 %v2176_v21 }
 0x9d1   : > { %v1333_v20 = vpack.c.bf16 %v1331_v18, %v1331_v18  ;;  %2097 = vmatprep.subr.bf16.mxu1 %v2291_v1  ;;  %v2185_v18 = vld [vmem:[%s2742_s9 + $0x30] sm:$0xff]  }
 0x9d3   : > { %2078 = vmatmul.mubr.msk.bf16.vlgmr.msra.gmra.mrb[36].mxu0 %vm529_vm2, %v1333_v20  ;;  %v2186_v20 = vld [vmem:[%s2742_s9 + $0x38] sm:$0xff]  }
 0x9d4   : > { %2093 = vmatprep.mubr.msk.bf16.mxu0 %vm2292_vm0, %v2291_v1 }
 0xa9e   : > { %v1376_v23 = vpop.f32.mrb[24].mxu1 }
 0xa9f   : > { %1432 = vrot.lane.b32.xlu0 %v1376_v23, %s2306_s24  ;;  %v2073_v24 = vpop.f32.mrb[25].mxu1 }
 0xaa0   : > { %v1379_v25 = vpop.f32.mrb[26].mxu1 }
 0xaa1   : > { %v2074_v26 = vpop.f32.mrb[27].mxu1 }
 0xaa6   : > { %v1424_v27 = vpop.f32.mrb[36].mxu0 }
 0xaa7   : > { %1434 = vrot.lane.b32.xlu1 %v1424_v27, %s2306_s24  ;;  %v2079_v28 = vpop.f32.mrb[37].mxu0  ;;  %s432_s24 = sand.u32 1, %s2281_s26  }
 0xaa8   : > { %v1427_v29 = vpop.f32.mrb[38].mxu0  ;;  %s1869_s15 = sshll.u32 %s432_s24, 4  ;;  %s2691_s29 = scalar_lea.sflag [#allocation4], %s432_s24 }
 0xaa9   : > { %v2080_v30 = vpop.f32.mrb[39].mxu0  ;;  %s434_s23 = scalar_lea.vmem [#allocation3], %s1869_s15 }
 0xaaa   : > { %s1803_s0 = sshll.u32 %s434_s23, 4  ;;  %s2688_s0 = int_to_ptr.vmem [resolvable:$true] %s1803_s0 }
 0xaab   : > { %s2227_s15 = scalar_lea.vmem %s2688_s0, 256  ;;  %p2234_p0 = scmp.lt.s32.totalorder %s2688_s0, %s2232_s2 }
 0xaac   : > { %p2228_p11 = scmp.ne.s32.totalorder %s2688_s0, %s2227_s15  ;;  %p2235_p1 = scmp.lt.s32.totalorder %s2233_s30, %s2227_s15 }
 0xaae   : > { %p2229_p12 = pnand %p2228_p11, %p2417_p5  ;;  %p2236_p2 = por %p2235_p1, %p2234_p0 }
 0xab0   : > { %p2230_p13 = pneg %p2229_p12 }
 0xab2   : > { %p2237_p3 = pnand %p2236_p2, %p2230_p13 }
 0xb11   : > { %v1433_v19 = vpop.permute.xlu0 %1432 }
 0xb12   : > { %1439 = vst.msk [vmem:[#allocation2] sm:$0xff] %vm1438_vm6, %v1433_v19 }
 0xb19   : > { %v1435_v31 = vpop.permute.xlu1 %1434  ;;  %v1441_v32 = vld [vmem:[#allocation2] sm:$0xff] }
 0xb1a   : > { %1440 = vst.msk [vmem:[#allocation2 + $0x8] sm:$0xff] %vm1438_vm6, %v1435_v31 }
 0xb21   : > { %v1442_v33 = vld [vmem:[#allocation2 + $0x8] sm:$0xff] }
 0xb22   : > { %v1443_v34 = vpack.c.bf16 %v1442_v33, %v1441_v32 }
 0xb24   : > { %2086 = vmatmul.mubr.msk.bf16.vlgmr.msra.gmra.mrb[28].mxu1 %vm469_vm1, %v1443_v34 }
 0xb25   : > { %2113 = vmatprep.mubr.msk.bf16.mxu1 %vm2292_vm0, %v2291_v1  ;;  %2098 = vmatpush3.bf16.msra.mxu1 %v2179_v58 }
 0xb26   : > { %2099 = vmatprep.subr.bf16.mxu1 %v2291_v1 }
 0xb29   : > { %2100 = vmatpush3.bf16.msra.mxu1 %v2180_v59 }
 0xb2a   : > { %2101 = vmatprep.subr.bf16.mxu1 %v2291_v1 }
 0xb2d   : > { %2102 = vmatpush3.bf16.msra.mxu1 %v2181_v60  ;;  %v1916_v60 = vld [vmem:[%s2745_s12] ss:$0 sm:$0xff] }
 0xb2e   : > { %2103 = vmatprep.subr.bf16.mxu1 %v2291_v1 }
 0xb31   : > { %2104 = vmatpush3.bf16.msra.mxu1 %v2182_v61 }
 0xb32   : > { %2105 = vmatprep.subr.bf16.mxu1 %v2291_v1 }
 0xb35   : > { %2106 = vmatpush3.bf16.msra.mxu1 %v2183_v62 }
 0xb36   : > { %2107 = vmatprep.subr.bf16.mxu1 %v2291_v1 }
 0xb39   : > { %2108 = vmatpush3.bf16.msra.mxu1 %v2184_v63 }
 0xb3a   : > { %2109 = vmatprep.subr.bf16.mxu1 %v2291_v1 }
 0xb3d   : > { %2110 = vmatpush3.bf16.msra.mxu1 %v2185_v18 }
 0xb3e   : > { %2111 = vmatprep.subr.bf16.mxu1 %v2291_v1 }
 0xb41   : > { %2112 = vmatpush3.bf16.msra.mxu1 %v2186_v20 }
 0xbf7   : > { %v1504_v36 = vpop.f32.mrb[28].mxu1 }
 0xbf8   : > { %v1505_v37 = vadd.f32 %v1896_v35, %v1504_v36  ;;  %v2087_v38 = vpop.f32.mrb[29].mxu1 }
 0xbf9   : > { %v1507_v39 = vpop.f32.mrb[30].mxu1 }
 0xbfa   : > { %v1508_v40 = vadd.f32 %v1896_v35, %v1507_v39  ;;  %v2088_v41 = vpop.f32.mrb[31].mxu1  ;;  %v1511_v42 = vadd.f32 %v1505_v37, %v2445_v3 }
 0xbfc   : > { %v1515_v43 = vsel %vm469_vm1, %v1511_v42, 0.0  ;;  %v1512_v44 = vadd.f32 %v1508_v40, %v2447_v4  ;;  %v2177_v4 = vld [vmem:[%s2740_s7] sm:$0xff]  }
 0xbfd   : > { %1516 = vadd.xlane.f32.xlu0 %v1515_v43  ;;  %2090 = vmatpush3.bf16.msra.mxu0 %v2177_v4 }
 0xbfe   : > { %v1518_v45 = vsel %vm469_vm1, %v1512_v44, 0.0  ;;  %2091 = vmatprep.subr.bf16.mxu0 %v2291_v1  ;;  %v1906_v1 = vld [vmem:[%s2743_s10] ss:$0 sm:$0xff] }
 0xbff   : > { %1519 = vadd.xlane.f32.xlu1 %v1518_v45 }
 0xc01   : > { %2092 = vmatpush3.bf16.msra.mxu0 %v2178_v57  ;;  %v1915_v57 = vld [vmem:[%s2744_s11] ss:$0 sm:$0xff] }
 0xc8a   : > { %v1517_v46 = vpop.xlane.xlu0 %1516 }
 0xc8b   : > { %v1522_v47 = vmul.f32 0.03125, %v1517_v46 }
 0xc8c   : > { %v1520_v48 = vpop.xlane.xlu1 %1519 }
 0xc8d   : > { %v1524_v49 = vsub.f32 %v1511_v42, %v1522_v47  ;;  %v1523_v51 = vmul.f32 0.03125, %v1520_v48 }
 0xc8f   : > { %v1525_v52 = vsub.f32 %v1512_v44, %v1523_v51  ;;  %v1526_v53 = vmul.f32 %v1524_v49, %v1524_v49 }
 0xc91   : > { %v1528_v55 = vsel %vm469_vm1, %v1526_v53, 0.0  ;;  %v1527_v56 = vmul.f32 %v1525_v52, %v1525_v52 }
 0xc92   : > { %1529 = vadd.xlane.f32.xlu0 %v1528_v55 }
 0xc93   : > { %v1531_v3 = vsel %vm469_vm1, %v1527_v56, 0.0 }
 0xc96   : > { %1532 = vadd.xlane.f32.xlu0 %v1531_v3 }
 0xd1f   : > { %v1530_v11 = vpop.xlane.xlu0 %1529 }
 0xd20   : > { %v1534_v0 = vmul.f32 0.03125, %v1530_v11 }
 0xd22   : > { %v1536_v50 = vadd.f32 1e-05, %v1534_v0 }
 0xd23   : > { %v1533_v54 = vpop.xlane.xlu0 %1532 }
 0xd24   : > { %2219 = vrsqrt.f32 %v1536_v50  ;;  %v1535_v2 = vmul.f32 0.03125, %v1533_v54 }
 0xd26   : > { %v1537_v5 = vadd.f32 1e-05, %v1535_v2 }
 0xd28   : > { %2221 = vrsqrt.f32 %v1537_v5 }
 0xd2e   : > { %v2220_v6 = vpop.eup %2219 }
 0xd2f   : > { %v1540_v7 = vmul.f32 %v2220_v6, %v1524_v49 }
 0xd31   : > { %v1548_v10 = vmul.f32 %v1900_v8, %v1540_v7 }
 0xd32   : > { %v2222_v9 = vpop.eup %2221 }
 0xd33   : > { %v1541_v12 = vmul.f32 %v2222_v9, %v1525_v52  ;;  %v1556_v16 = vadd.f32 %v1901_v13, %v1548_v10 }
 0xd35   : > { %v1549_v15 = vmul.f32 %v1900_v8, %v1541_v12 }
 0xd37   : > { %v1557_v17 = vadd.f32 %v1901_v13, %v1549_v15 }
 0xd39   : > { %v1558_v14 = vpack.c.bf16 %v1557_v17, %v1556_v16 }
 0xd3b   : > { %2094 = vmatmul.mubr.msk.bf16.vlgmr.msra.gmra.mrb[40].mxu0 %vm469_vm1, %v1558_v14 }
 0xe0e   : > { %v1619_v21 = vpop.f32.mrb[40].mxu0 }
 0xe0f   : > { %v1620_v23 = vadd.f32 %v1902_v22, %v1619_v21  ;;  %v2095_v24 = vpop.f32.mrb[41].mxu0 }
 0xe10   : > { %v1622_v25 = vpop.f32.mrb[42].mxu0 }
 0xe11   : > { %v1623_v26 = vadd.f32 %v1902_v22, %v1622_v25  ;;  %v2096_v27 = vpop.f32.mrb[43].mxu0  ;;  %v1626_v28 = vmax.f32 %v1620_v23, 0.0 }
 0xe13   : > { %v1627_v29 = vmax.f32 %v1623_v26, 0.0 }
 0xe15   : > { %v1628_v30 = vpack.c.bf16 %v1627_v29, %v1626_v28 }
 0xe17   : > { %2114 = vmatmul.mubr.bf16.vlgmr.msra.gmra.mrb[32].mxu1 %v1628_v30 }
 0xeea   : > { %v1734_v19 = vpop.f32.mrb[32].mxu1 }
 0xeeb   : > { %v1735_v31 = vadd.f32 %v1906_v1, %v1734_v19  ;;  %v2115_v32 = vpop.f32.mrb[33].mxu1 }
 0xeec   : > { %v1737_v33 = vpop.f32.mrb[34].mxu1 }
 0xeed   : > { %v1738_v34 = vadd.f32 %v1906_v1, %v1737_v33  ;;  %v2116_v35 = vpop.f32.mrb[35].mxu1  ;;  %v1741_v36 = vadd.f32 %v1735_v31, %v1556_v16 }
 0xeef   : > { %v1745_v37 = vsel %vm469_vm1, %v1741_v36, 0.0  ;;  %v1742_v38 = vadd.f32 %v1738_v34, %v1557_v17 }
 0xef0   : > { %1746 = vadd.xlane.f32.xlu1 %v1745_v37 }
 0xef1   : > { %v1748_v39 = vsel %vm469_vm1, %v1742_v38, 0.0 }
 0xef2   : > { %1749 = vadd.xlane.f32.xlu0 %v1748_v39 }
 0xf7d   : > { %v1747_v40 = vpop.xlane.xlu1 %1746 }
 0xf7e   : > { %v1751_v41 = vmul.f32 0.03125, %v1747_v40 }
 0xf7f   : > { %v1750_v42 = vpop.xlane.xlu0 %1749 }
 0xf80   : > { %v1753_v43 = vsub.f32 %v1741_v36, %v1751_v41  ;;  %v1752_v44 = vmul.f32 0.03125, %v1750_v42 }
 0xf82   : > { %v1754_v45 = vsub.f32 %v1742_v38, %v1752_v44  ;;  %v1755_v46 = vmul.f32 %v1753_v43, %v1753_v43 }
 0xf84   : > { %v1757_v47 = vsel %vm469_vm1, %v1755_v46, 0.0  ;;  %v1756_v48 = vmul.f32 %v1754_v45, %v1754_v45 }
 0xf85   : > { %1758 = vadd.xlane.f32.xlu1 %v1757_v47 }
 0xf86   : > { %v1760_v49 = vsel %vm469_vm1, %v1756_v48, 0.0 }
 0xf87   : > { %1761 = vadd.xlane.f32.xlu0 %v1760_v49 }
0x1012   : > { %v1759_v51 = vpop.xlane.xlu1 %1758 }
0x1013   : > { %v1763_v52 = vmul.f32 0.03125, %v1759_v51 }
0x1014   : > { %v1762_v53 = vpop.xlane.xlu0 %1761 }
0x1015   : > { %v1765_v55 = vadd.f32 1e-05, %v1763_v52  ;;  %v1764_v56 = vmul.f32 0.03125, %v1762_v53 }
0x1017   : > { %2223 = vrsqrt.f32 %v1765_v55  ;;  %v1766_v3 = vadd.f32 1e-05, %v1764_v56 }
0x1019   : > { %2225 = vrsqrt.f32 %v1766_v3 }
0x1021   : > { %v2224_v4 = vpop.eup %2223 }
0x1022   : > { %v1769_v58 = vmul.f32 %v2224_v4, %v1753_v43 }
0x1023   : > { %v2226_v59 = vpop.eup %2225 }
0x1024   : > { %v1777_v61 = vmul.f32 %v1915_v57, %v1769_v58  ;;  %v1770_v62 = vmul.f32 %v2226_v59, %v1754_v45 }
0x1026   : > { %v1785_v63 = vadd.f32 %v1916_v60, %v1777_v61  ;;  %v1778_v11 = vmul.f32 %v1915_v57, %v1770_v62 }
0x1028   : > { %v1786_v0 = vadd.f32 %v1916_v60, %v1778_v11  ;;  %1787 = vst.msk [vmem:[%s434_s23] sm:$0xff] %vm469_vm1, %v1785_v63 }
0x102a   : > { %1788 = vst.msk [vmem:[%s434_s23 + $0x8] sm:$0xff] %vm469_vm1, %v1786_v0 }
0x102b   : > { %2240 = shalt.err (!%p2237_p3)
}
0x102c   : > { %s2241_s24 = scalar_lea.hbm %s2685_s3, 256  ;;  %s2245_s21 = scalar_lea.hbm %s2746_s13, 512 }
0x102d   : > { %p2242_p4 = scmp.ne.s32.totalorder %s2685_s3, %s2241_s24  ;;  %p2246_p9 = scmp.lt.u32.totalorder %s2685_s3, %s2746_s13 }
0x102e   : > { %p2247_p10 = scmp.lt.u32.totalorder %s2245_s21, %s2241_s24  ;;  %p2249_p12 = scmp.lt.u32.totalorder %s2241_s24, %s2685_s3 }
0x102f   : > { %p2243_p7 = pnand %p2242_p4, %p2417_p5 }
0x1030   : > { %p2248_p11 = por %p2247_p10, %p2246_p9 }
0x1031   : > { %p2244_p8 = pneg %p2243_p7 }
0x1032   : > { %p2250_p13 = por %p2249_p12, %p2248_p11 }
0x1034   : > { %p2251_p0 = pnand %p2250_p13, %p2244_p8 }
0x1036   : > { %2254 = shalt.err (!%p2251_p0)
}
0x1037   : > { %s2308_s15 = smov 128   ;;  %s2758_s1 = smov 8  }
0x1038   : > { %2117 = dma.vmem_to_hbm [thread:$0]  (%p2417_p5), %s2688_s0, 256, %s2685_s3, %s2691_s29, %s2308_s15, %s2308_s15, %s2758_s1  }
0x1039 PF: > { %p2123_p1 = scmp.ge.s32.totalorder %s2289_s28, 2  ;;  %s1818_s2 = sand.u32 1, %s2277_s25  }
0x103a   : > { %s1819_s30 = scalar_lea.sflag [#allocation4], %s1818_s2 }
0x103b   : > { %p2120_p2 = pnand %p2123_p1, %p2421_p6 }
0x103d   : > { %2272 = dma.done.wait (!%p2120_p2), %s1819_s30, 256  }
0x103e   : > { %2274 = vsyncadd (!%p2120_p2), %s1819_s30, 4294967040  ;;  %p23_p3 = scmp.ge.s32.totalorder %s2404_s14, 4   ;;  %s2759_s25 = smov %s2281_s26 }
0x103f   : > { %s2760_s26 = smov %s2285_s27  ;;  %s2761_s27 = smov %s2415_s17 }
0x1040   : > { %s2762_s28 = smov %s2404_s14  ;;  %25 = sbr.rel (!%p23_p3) target bundleno = 8 (0x8), region = 107 }
0x1047   :  { %1824 = vsyncpa [#allocation4], 1 }
0x1048   :  { %1826 = vsyncpa [#allocation4 + $0x1], 1 }

</bundles_post_ra>
